<compile_context>
chip_gen: v7x
topology: tpu7x:2x2x1
jax: 0.10.0
libtpu: 0.0.40
codegen_flags: <defaults>
</compile_context>

<pallas_src>
import functools

import jax
import jax.numpy as jnp
from jax import lax
from jax.experimental import pallas as pl
from jax.experimental.pallas import tpu as pltpu


def _softsort_kernel(s_t_ref, out_ref, *, n, tau, hard):
    """One grid step: bB batch rows.

    s_t_ref : (n, bB)    s_t_ref[j, b] = scores[b, j]   (batch rows on the lane axis)
    out_ref : (bB, n*n)  out_ref[b, i*n + j] = P_hat[b, i, j]
    """
    f32 = jnp.float32
    bB = s_t_ref.shape[1]
    inv_tau = 1.0 / float(tau)

    s_t = s_t_ref[...].astype(f32)                        # (n, bB)
    jj = lax.broadcasted_iota(jnp.int32, (n, bB), 0)      # sublane index j
    jjf = jj.astype(f32)

    # ---- stable descending rank of every element (VPU-only, small O(n) loop) ----
    # rank[j, b] = #{k : s[b,k] > s[b,j]}  +  #{k < j : s[b,k] == s[b,j]}
    rank = jnp.zeros((n, bB), jnp.int32)
    for k in range(n):
        sk = s_t[k:k + 1, :]                              # (1, bB): scores[b, k]
        beats = jnp.logical_or(sk > s_t,
                               jnp.logical_and(sk == s_t, jj > k))
        rank = rank + beats.astype(jnp.int32)

    # ---- emit the n softmax rows, chunked so each on-chip transpose / store is
    # ---- ~128 lanes wide (dense vst, bounded live temporaries) ------------------
    csize = max(1, 128 // n)
    for c0 in range(0, n, csize):
        cn = min(csize, n - c0)
        pieces = []
        for i in range(c0, c0 + cn):
            sel = rank == i                               # exactly one True per column
            # sorted[b, i]; the selected score is copied exactly (sum of one value).
            sr_i = jnp.sum(jnp.where(sel, s_t, 0.0), axis=0, keepdims=True)  # (1, bB)
            if hard:
                # First column whose score equals the sorted value (torch.topk /
                # argmax tie behavior).
                eq = s_t == sr_i
                first_j = jnp.min(jnp.where(eq, jjf, float(n)),
                                  axis=0, keepdims=True)
                pieces.append((jjf == first_j).astype(f32))
            else:
                # Max logit is exactly 0 (sr_i is one of the scores), so no
                # max-subtraction is needed and exp() never overflows.
                e_i = jnp.exp(jnp.abs(s_t - sr_i) * (-inv_tau))              # (n, bB)
                den_i = jnp.sum(e_i, axis=0, keepdims=True)                  # (1, bB)
                pieces.append(e_i / den_i)
        chunk = pieces[0] if cn == 1 else jnp.concatenate(pieces, axis=0)    # (cn*n, bB)
        out_ref[:, c0 * n:(c0 + cn) * n] = jnp.transpose(chunk).astype(out_ref.dtype)


def softsort_p1(scores, *, tau=1.0, hard=False, target_block_bytes=4 << 20):
    """scores: (B, n) -> (B, n, n) relaxed (or hard) permutation matrices."""
    B, n = scores.shape
    out_dtype = scores.dtype
    NN = n * n
    row_bytes = 4 * NN

    # Per-block batch rows: ~target_block_bytes output blocks, at least 128 rows when
    # the batch allows (lane-dense compute / DMA), capped at ~12 MiB per block so the
    # double-buffered block + temporaries stay well inside the 40 MiB VMEM limit.
    bB_cap = max(8, ((12 << 20) // row_bytes) // 8 * 8)
    bB_want = max(128, target_block_bytes // row_bytes)
    bB_target = max(8, min(bB_cap, (bB_want // 8) * 8))
    # TODO(synk): for very large n (>~512) a single (bB, n*n) block no longer fits
    # VMEM; the i-chunks would additionally need to become a grid axis (row tiling).

    if B <= bB_target:
        nb = 1
        bB = -(-B // 8) * 8
    else:
        nb = -(-B // bB_target)
        if nb % 2:
            nb += 1                      # even grid -> balanced across v7x TensorCores
        rows = -(-B // nb)
        bB = -(-rows // 128) * 128       # multiple of 128: dense lanes + legal blocks
    B_pad = nb * bB

    s32 = scores.astype(jnp.float32)
    if B_pad != B:
        s32 = jnp.pad(s32, ((0, B_pad - B), (0, 0)))
    s_t = s32.T                          # (n, B_pad): tiny, lane-dense kernel input

    kernel = functools.partial(_softsort_kernel, n=n, tau=float(tau), hard=bool(hard))

    out = pl.pallas_call(
        kernel,
        out_shape=jax.ShapeDtypeStruct((B_pad, NN), out_dtype),
        grid_spec=pltpu.PrefetchScalarGridSpec(
            num_scalar_prefetch=0,
            grid=(nb,),
            in_specs=[pl.BlockSpec((n, bB), lambda b: (0, b))],
            out_specs=pl.BlockSpec((bB, NN), lambda b: (b, 0)),
        ),
        compiler_params=pltpu.CompilerParams(
            dimension_semantics=("parallel",),
            vmem_limit_bytes=40 * 1024 * 1024,   # headroom below v7x's 64 MiB physical
        ),
        cost_estimate=pl.CostEstimate(
            flops=int(B_pad * NN * 15),
            transcendentals=0 if hard else int(B_pad * NN),
            bytes_accessed=int(4 * B_pad * NN + 8 * B_pad * n),
        ),
    )(s_t)

    # Free epilogue: reshape is metadata-only, slice drops the batch padding.
    return out.reshape(B_pad, n, n)[:B]


def _softsort_ref(scores, tau=1.0, hard=False):
    """Pure-JAX reference mirroring the PyTorch module's forward pass."""
    sorted_desc = -jnp.sort(-scores, axis=1)                           # (B, n)
    logits = -jnp.abs(scores[:, None, :] - sorted_desc[:, :, None]) / tau
    p = jax.nn.softmax(logits, axis=-1)
    if hard:
        n = scores.shape[1]
        p = jax.nn.one_hot(jnp.argmax(p, axis=-1), n, dtype=p.dtype)
    return p


if __name__ == "__main__":
    key = jax.random.PRNGKey(0)

    # (B, n, tau, target_block_bytes): exercises the single-block path, padding,
    # a non-power-of-two n, the large-n (n >= 128) path, and a multi-block even grid.
    configs = [
        (2, 16, 1.0, 4 << 20),
        (40, 16, 0.7, 4 << 20),
        (4, 128, 1.0, 4 << 20),
        (7, 24, 1.3, 4 << 20),
        (300, 16, 1.0, 128 * 1024),
    ]
    for idx, (B, n, tau, tbb) in enumerate(configs):
        key, sub = jax.random.split(key)
        scores = jax.random.normal(sub, (B, n), dtype=jnp.float32)
        out = jax.block_until_ready(
            softsort_p1(scores, tau=tau, hard=False, target_block_bytes=tbb))
        ref = _softsort_ref(scores, tau=tau, hard=False)
        assert out.shape == (B, n, n)
        assert jnp.allclose(out, ref, atol=1e-5, rtol=1e-5), f"soft mismatch cfg {idx}"

    # hard=True forward value (one-hot at the argmax).
    key, sub = jax.random.split(key)
    scores = jax.random.normal(sub, (2, 16), dtype=jnp.float32)
    out_h = jax.block_until_ready(softsort_p1(scores, tau=1.0, hard=True))
    ref_h = _softsort_ref(scores, tau=1.0, hard=True)
    assert jnp.allclose(out_h, ref_h, atol=1e-6), "hard mismatch"

    print("KERNEL_OK")
</pallas_src>

<mosaic_0001>
module attributes {stable_mosaic.version = 11 : i64} {
  func.func @_softsort_kernel(%arg0: i32, %arg1: memref<16x8xf32, #tpu.memory_space<vmem>>, %arg2: memref<8x256xf32, #tpu.memory_space<vmem>>) attributes {dimension_semantics = [#tpu.dimension_semantics<parallel>], iteration_bounds = array<i64: 1>, scalar_prefetch = 0 : i64, scratch_operands = 0 : i64, tpu.core_type = #tpu.core_type<tc>, window_params = [{transform_indices = @transform_0, window_bounds = array<i64: 16, 8>}, {transform_indices = @transform_1, window_bounds = array<i64: 8, 256>}]} {
    %c0 = arith.constant 0 : index
    %c0_0 = arith.constant 0 : index
    %0 = vector.load %arg1[%c0, %c0_0] : memref<16x8xf32, #tpu.memory_space<vmem>>, vector<16x8xf32>
    %1 = tpu.iota {dimensions = array<i32: 0>} : vector<16x8xi32>
    %c0_i32 = arith.constant 0 : i32
    %2 = vector.broadcast %c0_i32 : i32 to vector<16x8xi32>
    %3 = vector.extract_strided_slice %0 {offsets = [0, 0], sizes = [1, 8], strides = [1, 1]} : vector<16x8xf32> to vector<1x8xf32>
    %4 = vector.broadcast %3 : vector<1x8xf32> to vector<16x8xf32>
    %5 = arith.cmpf ogt, %4, %0 : vector<16x8xf32>
    %6 = vector.broadcast %3 : vector<1x8xf32> to vector<16x8xf32>
    %7 = arith.cmpf oeq, %6, %0 : vector<16x8xf32>
    %c0_i32_1 = arith.constant 0 : i32
    %8 = vector.broadcast %c0_i32_1 : i32 to vector<16x8xi32>
    %9 = arith.cmpi sgt, %1, %8 : vector<16x8xi32>
    %10 = arith.andi %7, %9 : vector<16x8xi1>
    %11 = arith.ori %5, %10 : vector<16x8xi1>
    %12 = arith.extui %11 : vector<16x8xi1> to vector<16x8xi32>
    %13 = arith.addi %2, %12 : vector<16x8xi32>
    %14 = vector.extract_strided_slice %0 {offsets = [1, 0], sizes = [1, 8], strides = [1, 1]} : vector<16x8xf32> to vector<1x8xf32>
    %15 = vector.broadcast %14 : vector<1x8xf32> to vector<16x8xf32>
    %16 = arith.cmpf ogt, %15, %0 : vector<16x8xf32>
    %17 = vector.broadcast %14 : vector<1x8xf32> to vector<16x8xf32>
    %18 = arith.cmpf oeq, %17, %0 : vector<16x8xf32>
    %c1_i32 = arith.constant 1 : i32
    %19 = vector.broadcast %c1_i32 : i32 to vector<16x8xi32>
    %20 = arith.cmpi sgt, %1, %19 : vector<16x8xi32>
    %21 = arith.andi %18, %20 : vector<16x8xi1>
    %22 = arith.ori %16, %21 : vector<16x8xi1>
    %23 = arith.extui %22 : vector<16x8xi1> to vector<16x8xi32>
    %24 = arith.addi %13, %23 : vector<16x8xi32>
    %25 = vector.extract_strided_slice %0 {offsets = [2, 0], sizes = [1, 8], strides = [1, 1]} : vector<16x8xf32> to vector<1x8xf32>
    %26 = vector.broadcast %25 : vector<1x8xf32> to vector<16x8xf32>
    %27 = arith.cmpf ogt, %26, %0 : vector<16x8xf32>
    %28 = vector.broadcast %25 : vector<1x8xf32> to vector<16x8xf32>
    %29 = arith.cmpf oeq, %28, %0 : vector<16x8xf32>
    %c2_i32 = arith.constant 2 : i32
    %30 = vector.broadcast %c2_i32 : i32 to vector<16x8xi32>
    %31 = arith.cmpi sgt, %1, %30 : vector<16x8xi32>
    %32 = arith.andi %29, %31 : vector<16x8xi1>
    %33 = arith.ori %27, %32 : vector<16x8xi1>
    %34 = arith.extui %33 : vector<16x8xi1> to vector<16x8xi32>
    %35 = arith.addi %24, %34 : vector<16x8xi32>
    %36 = vector.extract_strided_slice %0 {offsets = [3, 0], sizes = [1, 8], strides = [1, 1]} : vector<16x8xf32> to vector<1x8xf32>
    %37 = vector.broadcast %36 : vector<1x8xf32> to vector<16x8xf32>
    %38 = arith.cmpf ogt, %37, %0 : vector<16x8xf32>
    %39 = vector.broadcast %36 : vector<1x8xf32> to vector<16x8xf32>
    %40 = arith.cmpf oeq, %39, %0 : vector<16x8xf32>
    %c3_i32 = arith.constant 3 : i32
    %41 = vector.broadcast %c3_i32 : i32 to vector<16x8xi32>
    %42 = arith.cmpi sgt, %1, %41 : vector<16x8xi32>
    %43 = arith.andi %40, %42 : vector<16x8xi1>
    %44 = arith.ori %38, %43 : vector<16x8xi1>
    %45 = arith.extui %44 : vector<16x8xi1> to vector<16x8xi32>
    %46 = arith.addi %35, %45 : vector<16x8xi32>
    %47 = vector.extract_strided_slice %0 {offsets = [4, 0], sizes = [1, 8], strides = [1, 1]} : vector<16x8xf32> to vector<1x8xf32>
    %48 = vector.broadcast %47 : vector<1x8xf32> to vector<16x8xf32>
    %49 = arith.cmpf ogt, %48, %0 : vector<16x8xf32>
    %50 = vector.broadcast %47 : vector<1x8xf32> to vector<16x8xf32>
    %51 = arith.cmpf oeq, %50, %0 : vector<16x8xf32>
    %c4_i32 = arith.constant 4 : i32
    %52 = vector.broadcast %c4_i32 : i32 to vector<16x8xi32>
    %53 = arith.cmpi sgt, %1, %52 : vector<16x8xi32>
    %54 = arith.andi %51, %53 : vector<16x8xi1>
    %55 = arith.ori %49, %54 : vector<16x8xi1>
    %56 = arith.extui %55 : vector<16x8xi1> to vector<16x8xi32>
    %57 = arith.addi %46, %56 : vector<16x8xi32>
    %58 = vector.extract_strided_slice %0 {offsets = [5, 0], sizes = [1, 8], strides = [1, 1]} : vector<16x8xf32> to vector<1x8xf32>
    %59 = vector.broadcast %58 : vector<1x8xf32> to vector<16x8xf32>
    %60 = arith.cmpf ogt, %59, %0 : vector<16x8xf32>
    %61 = vector.broadcast %58 : vector<1x8xf32> to vector<16x8xf32>
    %62 = arith.cmpf oeq, %61, %0 : vector<16x8xf32>
    %c5_i32 = arith.constant 5 : i32
    %63 = vector.broadcast %c5_i32 : i32 to vector<16x8xi32>
    %64 = arith.cmpi sgt, %1, %63 : vector<16x8xi32>
    %65 = arith.andi %62, %64 : vector<16x8xi1>
    %66 = arith.ori %60, %65 : vector<16x8xi1>
    %67 = arith.extui %66 : vector<16x8xi1> to vector<16x8xi32>
    %68 = arith.addi %57, %67 : vector<16x8xi32>
    %69 = vector.extract_strided_slice %0 {offsets = [6, 0], sizes = [1, 8], strides = [1, 1]} : vector<16x8xf32> to vector<1x8xf32>
    %70 = vector.broadcast %69 : vector<1x8xf32> to vector<16x8xf32>
    %71 = arith.cmpf ogt, %70, %0 : vector<16x8xf32>
    %72 = vector.broadcast %69 : vector<1x8xf32> to vector<16x8xf32>
    %73 = arith.cmpf oeq, %72, %0 : vector<16x8xf32>
    %c6_i32 = arith.constant 6 : i32
    %74 = vector.broadcast %c6_i32 : i32 to vector<16x8xi32>
    %75 = arith.cmpi sgt, %1, %74 : vector<16x8xi32>
    %76 = arith.andi %73, %75 : vector<16x8xi1>
    %77 = arith.ori %71, %76 : vector<16x8xi1>
    %78 = arith.extui %77 : vector<16x8xi1> to vector<16x8xi32>
    %79 = arith.addi %68, %78 : vector<16x8xi32>
    %80 = vector.extract_strided_slice %0 {offsets = [7, 0], sizes = [1, 8], strides = [1, 1]} : vector<16x8xf32> to vector<1x8xf32>
    %81 = vector.broadcast %80 : vector<1x8xf32> to vector<16x8xf32>
    %82 = arith.cmpf ogt, %81, %0 : vector<16x8xf32>
    %83 = vector.broadcast %80 : vector<1x8xf32> to vector<16x8xf32>
    %84 = arith.cmpf oeq, %83, %0 : vector<16x8xf32>
    %c7_i32 = arith.constant 7 : i32
    %85 = vector.broadcast %c7_i32 : i32 to vector<16x8xi32>
    %86 = arith.cmpi sgt, %1, %85 : vector<16x8xi32>
    %87 = arith.andi %84, %86 : vector<16x8xi1>
    %88 = arith.ori %82, %87 : vector<16x8xi1>
    %89 = arith.extui %88 : vector<16x8xi1> to vector<16x8xi32>
    %90 = arith.addi %79, %89 : vector<16x8xi32>
    %91 = vector.extract_strided_slice %0 {offsets = [8, 0], sizes = [1, 8], strides = [1, 1]} : vector<16x8xf32> to vector<1x8xf32>
    %92 = vector.broadcast %91 : vector<1x8xf32> to vector<16x8xf32>
    %93 = arith.cmpf ogt, %92, %0 : vector<16x8xf32>
    %94 = vector.broadcast %91 : vector<1x8xf32> to vector<16x8xf32>
    %95 = arith.cmpf oeq, %94, %0 : vector<16x8xf32>
    %c8_i32 = arith.constant 8 : i32
    %96 = vector.broadcast %c8_i32 : i32 to vector<16x8xi32>
    %97 = arith.cmpi sgt, %1, %96 : vector<16x8xi32>
    %98 = arith.andi %95, %97 : vector<16x8xi1>
    %99 = arith.ori %93, %98 : vector<16x8xi1>
    %100 = arith.extui %99 : vector<16x8xi1> to vector<16x8xi32>
    %101 = arith.addi %90, %100 : vector<16x8xi32>
    %102 = vector.extract_strided_slice %0 {offsets = [9, 0], sizes = [1, 8], strides = [1, 1]} : vector<16x8xf32> to vector<1x8xf32>
    %103 = vector.broadcast %102 : vector<1x8xf32> to vector<16x8xf32>
    %104 = arith.cmpf ogt, %103, %0 : vector<16x8xf32>
    %105 = vector.broadcast %102 : vector<1x8xf32> to vector<16x8xf32>
    %106 = arith.cmpf oeq, %105, %0 : vector<16x8xf32>
    %c9_i32 = arith.constant 9 : i32
    %107 = vector.broadcast %c9_i32 : i32 to vector<16x8xi32>
    %108 = arith.cmpi sgt, %1, %107 : vector<16x8xi32>
    %109 = arith.andi %106, %108 : vector<16x8xi1>
    %110 = arith.ori %104, %109 : vector<16x8xi1>
    %111 = arith.extui %110 : vector<16x8xi1> to vector<16x8xi32>
    %112 = arith.addi %101, %111 : vector<16x8xi32>
    %113 = vector.extract_strided_slice %0 {offsets = [10, 0], sizes = [1, 8], strides = [1, 1]} : vector<16x8xf32> to vector<1x8xf32>
    %114 = vector.broadcast %113 : vector<1x8xf32> to vector<16x8xf32>
    %115 = arith.cmpf ogt, %114, %0 : vector<16x8xf32>
    %116 = vector.broadcast %113 : vector<1x8xf32> to vector<16x8xf32>
    %117 = arith.cmpf oeq, %116, %0 : vector<16x8xf32>
    %c10_i32 = arith.constant 10 : i32
    %118 = vector.broadcast %c10_i32 : i32 to vector<16x8xi32>
    %119 = arith.cmpi sgt, %1, %118 : vector<16x8xi32>
    %120 = arith.andi %117, %119 : vector<16x8xi1>
    %121 = arith.ori %115, %120 : vector<16x8xi1>
    %122 = arith.extui %121 : vector<16x8xi1> to vector<16x8xi32>
    %123 = arith.addi %112, %122 : vector<16x8xi32>
    %124 = vector.extract_strided_slice %0 {offsets = [11, 0], sizes = [1, 8], strides = [1, 1]} : vector<16x8xf32> to vector<1x8xf32>
    %125 = vector.broadcast %124 : vector<1x8xf32> to vector<16x8xf32>
    %126 = arith.cmpf ogt, %125, %0 : vector<16x8xf32>
    %127 = vector.broadcast %124 : vector<1x8xf32> to vector<16x8xf32>
    %128 = arith.cmpf oeq, %127, %0 : vector<16x8xf32>
    %c11_i32 = arith.constant 11 : i32
    %129 = vector.broadcast %c11_i32 : i32 to vector<16x8xi32>
    %130 = arith.cmpi sgt, %1, %129 : vector<16x8xi32>
    %131 = arith.andi %128, %130 : vector<16x8xi1>
    %132 = arith.ori %126, %131 : vector<16x8xi1>
    %133 = arith.extui %132 : vector<16x8xi1> to vector<16x8xi32>
    %134 = arith.addi %123, %133 : vector<16x8xi32>
    %135 = vector.extract_strided_slice %0 {offsets = [12, 0], sizes = [1, 8], strides = [1, 1]} : vector<16x8xf32> to vector<1x8xf32>
    %136 = vector.broadcast %135 : vector<1x8xf32> to vector<16x8xf32>
    %137 = arith.cmpf ogt, %136, %0 : vector<16x8xf32>
    %138 = vector.broadcast %135 : vector<1x8xf32> to vector<16x8xf32>
    %139 = arith.cmpf oeq, %138, %0 : vector<16x8xf32>
    %c12_i32 = arith.constant 12 : i32
    %140 = vector.broadcast %c12_i32 : i32 to vector<16x8xi32>
    %141 = arith.cmpi sgt, %1, %140 : vector<16x8xi32>
    %142 = arith.andi %139, %141 : vector<16x8xi1>
    %143 = arith.ori %137, %142 : vector<16x8xi1>
    %144 = arith.extui %143 : vector<16x8xi1> to vector<16x8xi32>
    %145 = arith.addi %134, %144 : vector<16x8xi32>
    %146 = vector.extract_strided_slice %0 {offsets = [13, 0], sizes = [1, 8], strides = [1, 1]} : vector<16x8xf32> to vector<1x8xf32>
    %147 = vector.broadcast %146 : vector<1x8xf32> to vector<16x8xf32>
    %148 = arith.cmpf ogt, %147, %0 : vector<16x8xf32>
    %149 = vector.broadcast %146 : vector<1x8xf32> to vector<16x8xf32>
    %150 = arith.cmpf oeq, %149, %0 : vector<16x8xf32>
    %c13_i32 = arith.constant 13 : i32
    %151 = vector.broadcast %c13_i32 : i32 to vector<16x8xi32>
    %152 = arith.cmpi sgt, %1, %151 : vector<16x8xi32>
    %153 = arith.andi %150, %152 : vector<16x8xi1>
    %154 = arith.ori %148, %153 : vector<16x8xi1>
    %155 = arith.extui %154 : vector<16x8xi1> to vector<16x8xi32>
    %156 = arith.addi %145, %155 : vector<16x8xi32>
    %157 = vector.extract_strided_slice %0 {offsets = [14, 0], sizes = [1, 8], strides = [1, 1]} : vector<16x8xf32> to vector<1x8xf32>
    %158 = vector.broadcast %157 : vector<1x8xf32> to vector<16x8xf32>
    %159 = arith.cmpf ogt, %158, %0 : vector<16x8xf32>
    %160 = vector.broadcast %157 : vector<1x8xf32> to vector<16x8xf32>
    %161 = arith.cmpf oeq, %160, %0 : vector<16x8xf32>
    %c14_i32 = arith.constant 14 : i32
    %162 = vector.broadcast %c14_i32 : i32 to vector<16x8xi32>
    %163 = arith.cmpi sgt, %1, %162 : vector<16x8xi32>
    %164 = arith.andi %161, %163 : vector<16x8xi1>
    %165 = arith.ori %159, %164 : vector<16x8xi1>
    %166 = arith.extui %165 : vector<16x8xi1> to vector<16x8xi32>
    %167 = arith.addi %156, %166 : vector<16x8xi32>
    %168 = vector.extract_strided_slice %0 {offsets = [15, 0], sizes = [1, 8], strides = [1, 1]} : vector<16x8xf32> to vector<1x8xf32>
    %169 = vector.broadcast %168 : vector<1x8xf32> to vector<16x8xf32>
    %170 = arith.cmpf ogt, %169, %0 : vector<16x8xf32>
    %171 = vector.broadcast %168 : vector<1x8xf32> to vector<16x8xf32>
    %172 = arith.cmpf oeq, %171, %0 : vector<16x8xf32>
    %c15_i32 = arith.constant 15 : i32
    %173 = vector.broadcast %c15_i32 : i32 to vector<16x8xi32>
    %174 = arith.cmpi sgt, %1, %173 : vector<16x8xi32>
    %175 = arith.andi %172, %174 : vector<16x8xi1>
    %176 = arith.ori %170, %175 : vector<16x8xi1>
    %177 = arith.extui %176 : vector<16x8xi1> to vector<16x8xi32>
    %178 = arith.addi %167, %177 : vector<16x8xi32>
    %c0_i32_2 = arith.constant 0 : i32
    %179 = vector.broadcast %c0_i32_2 : i32 to vector<16x8xi32>
    %180 = arith.cmpi eq, %178, %179 : vector<16x8xi32>
    %cst = arith.constant 0.000000e+00 : f32
    %181 = vector.broadcast %cst : f32 to vector<16x8xf32>
    %182 = arith.select %180, %0, %181 : vector<16x8xi1>, vector<16x8xf32>
    %cst_3 = arith.constant dense<0.000000e+00> : vector<8xf32>
    %183 = vector.multi_reduction <add>, %182, %cst_3 [0] : vector<16x8xf32> to vector<8xf32>
    %184 = vector.shape_cast %183 : vector<8xf32> to vector<1x8xf32>
    %185 = vector.broadcast %184 : vector<1x8xf32> to vector<16x8xf32>
    %186 = arith.subf %0, %185 : vector<16x8xf32>
    %187 = math.absf %186 : vector<16x8xf32>
    %cst_4 = arith.constant -1.000000e+00 : f32
    %188 = vector.broadcast %cst_4 : f32 to vector<16x8xf32>
    %189 = arith.mulf %187, %188 : vector<16x8xf32>
    %190 = math.exp %189 : vector<16x8xf32>
    %cst_5 = arith.constant dense<0.000000e+00> : vector<8xf32>
    %191 = vector.multi_reduction <add>, %190, %cst_5 [0] : vector<16x8xf32> to vector<8xf32>
    %192 = vector.shape_cast %191 : vector<8xf32> to vector<1x8xf32>
    %193 = vector.broadcast %192 : vector<1x8xf32> to vector<16x8xf32>
    %194 = arith.divf %190, %193 : vector<16x8xf32>
    %c1_i32_6 = arith.constant 1 : i32
    %195 = vector.broadcast %c1_i32_6 : i32 to vector<16x8xi32>
    %196 = arith.cmpi eq, %178, %195 : vector<16x8xi32>
    %cst_7 = arith.constant 0.000000e+00 : f32
    %197 = vector.broadcast %cst_7 : f32 to vector<16x8xf32>
    %198 = arith.select %196, %0, %197 : vector<16x8xi1>, vector<16x8xf32>
    %cst_8 = arith.constant dense<0.000000e+00> : vector<8xf32>
    %199 = vector.multi_reduction <add>, %198, %cst_8 [0] : vector<16x8xf32> to vector<8xf32>
    %200 = vector.shape_cast %199 : vector<8xf32> to vector<1x8xf32>
    %201 = vector.broadcast %200 : vector<1x8xf32> to vector<16x8xf32>
    %202 = arith.subf %0, %201 : vector<16x8xf32>
    %203 = math.absf %202 : vector<16x8xf32>
    %cst_9 = arith.constant -1.000000e+00 : f32
    %204 = vector.broadcast %cst_9 : f32 to vector<16x8xf32>
    %205 = arith.mulf %203, %204 : vector<16x8xf32>
    %206 = math.exp %205 : vector<16x8xf32>
    %cst_10 = arith.constant dense<0.000000e+00> : vector<8xf32>
    %207 = vector.multi_reduction <add>, %206, %cst_10 [0] : vector<16x8xf32> to vector<8xf32>
    %208 = vector.shape_cast %207 : vector<8xf32> to vector<1x8xf32>
    %209 = vector.broadcast %208 : vector<1x8xf32> to vector<16x8xf32>
    %210 = arith.divf %206, %209 : vector<16x8xf32>
    %c2_i32_11 = arith.constant 2 : i32
    %211 = vector.broadcast %c2_i32_11 : i32 to vector<16x8xi32>
    %212 = arith.cmpi eq, %178, %211 : vector<16x8xi32>
    %cst_12 = arith.constant 0.000000e+00 : f32
    %213 = vector.broadcast %cst_12 : f32 to vector<16x8xf32>
    %214 = arith.select %212, %0, %213 : vector<16x8xi1>, vector<16x8xf32>
    %cst_13 = arith.constant dense<0.000000e+00> : vector<8xf32>
    %215 = vector.multi_reduction <add>, %214, %cst_13 [0] : vector<16x8xf32> to vector<8xf32>
    %216 = vector.shape_cast %215 : vector<8xf32> to vector<1x8xf32>
    %217 = vector.broadcast %216 : vector<1x8xf32> to vector<16x8xf32>
    %218 = arith.subf %0, %217 : vector<16x8xf32>
    %219 = math.absf %218 : vector<16x8xf32>
    %cst_14 = arith.constant -1.000000e+00 : f32
    %220 = vector.broadcast %cst_14 : f32 to vector<16x8xf32>
    %221 = arith.mulf %219, %220 : vector<16x8xf32>
    %222 = math.exp %221 : vector<16x8xf32>
    %cst_15 = arith.constant dense<0.000000e+00> : vector<8xf32>
    %223 = vector.multi_reduction <add>, %222, %cst_15 [0] : vector<16x8xf32> to vector<8xf32>
    %224 = vector.shape_cast %223 : vector<8xf32> to vector<1x8xf32>
    %225 = vector.broadcast %224 : vector<1x8xf32> to vector<16x8xf32>
    %226 = arith.divf %222, %225 : vector<16x8xf32>
    %c3_i32_16 = arith.constant 3 : i32
    %227 = vector.broadcast %c3_i32_16 : i32 to vector<16x8xi32>
    %228 = arith.cmpi eq, %178, %227 : vector<16x8xi32>
    %cst_17 = arith.constant 0.000000e+00 : f32
    %229 = vector.broadcast %cst_17 : f32 to vector<16x8xf32>
    %230 = arith.select %228, %0, %229 : vector<16x8xi1>, vector<16x8xf32>
    %cst_18 = arith.constant dense<0.000000e+00> : vector<8xf32>
    %231 = vector.multi_reduction <add>, %230, %cst_18 [0] : vector<16x8xf32> to vector<8xf32>
    %232 = vector.shape_cast %231 : vector<8xf32> to vector<1x8xf32>
    %233 = vector.broadcast %232 : vector<1x8xf32> to vector<16x8xf32>
    %234 = arith.subf %0, %233 : vector<16x8xf32>
    %235 = math.absf %234 : vector<16x8xf32>
    %cst_19 = arith.constant -1.000000e+00 : f32
    %236 = vector.broadcast %cst_19 : f32 to vector<16x8xf32>
    %237 = arith.mulf %235, %236 : vector<16x8xf32>
    %238 = math.exp %237 : vector<16x8xf32>
    %cst_20 = arith.constant dense<0.000000e+00> : vector<8xf32>
    %239 = vector.multi_reduction <add>, %238, %cst_20 [0] : vector<16x8xf32> to vector<8xf32>
    %240 = vector.shape_cast %239 : vector<8xf32> to vector<1x8xf32>
    %241 = vector.broadcast %240 : vector<1x8xf32> to vector<16x8xf32>
    %242 = arith.divf %238, %241 : vector<16x8xf32>
    %c4_i32_21 = arith.constant 4 : i32
    %243 = vector.broadcast %c4_i32_21 : i32 to vector<16x8xi32>
    %244 = arith.cmpi eq, %178, %243 : vector<16x8xi32>
    %cst_22 = arith.constant 0.000000e+00 : f32
    %245 = vector.broadcast %cst_22 : f32 to vector<16x8xf32>
    %246 = arith.select %244, %0, %245 : vector<16x8xi1>, vector<16x8xf32>
    %cst_23 = arith.constant dense<0.000000e+00> : vector<8xf32>
    %247 = vector.multi_reduction <add>, %246, %cst_23 [0] : vector<16x8xf32> to vector<8xf32>
    %248 = vector.shape_cast %247 : vector<8xf32> to vector<1x8xf32>
    %249 = vector.broadcast %248 : vector<1x8xf32> to vector<16x8xf32>
    %250 = arith.subf %0, %249 : vector<16x8xf32>
    %251 = math.absf %250 : vector<16x8xf32>
    %cst_24 = arith.constant -1.000000e+00 : f32
    %252 = vector.broadcast %cst_24 : f32 to vector<16x8xf32>
    %253 = arith.mulf %251, %252 : vector<16x8xf32>
    %254 = math.exp %253 : vector<16x8xf32>
    %cst_25 = arith.constant dense<0.000000e+00> : vector<8xf32>
    %255 = vector.multi_reduction <add>, %254, %cst_25 [0] : vector<16x8xf32> to vector<8xf32>
    %256 = vector.shape_cast %255 : vector<8xf32> to vector<1x8xf32>
    %257 = vector.broadcast %256 : vector<1x8xf32> to vector<16x8xf32>
    %258 = arith.divf %254, %257 : vector<16x8xf32>
    %c5_i32_26 = arith.constant 5 : i32
    %259 = vector.broadcast %c5_i32_26 : i32 to vector<16x8xi32>
    %260 = arith.cmpi eq, %178, %259 : vector<16x8xi32>
    %cst_27 = arith.constant 0.000000e+00 : f32
    %261 = vector.broadcast %cst_27 : f32 to vector<16x8xf32>
    %262 = arith.select %260, %0, %261 : vector<16x8xi1>, vector<16x8xf32>
    %cst_28 = arith.constant dense<0.000000e+00> : vector<8xf32>
    %263 = vector.multi_reduction <add>, %262, %cst_28 [0] : vector<16x8xf32> to vector<8xf32>
    %264 = vector.shape_cast %263 : vector<8xf32> to vector<1x8xf32>
    %265 = vector.broadcast %264 : vector<1x8xf32> to vector<16x8xf32>
    %266 = arith.subf %0, %265 : vector<16x8xf32>
    %267 = math.absf %266 : vector<16x8xf32>
    %cst_29 = arith.constant -1.000000e+00 : f32
    %268 = vector.broadcast %cst_29 : f32 to vector<16x8xf32>
    %269 = arith.mulf %267, %268 : vector<16x8xf32>
    %270 = math.exp %269 : vector<16x8xf32>
    %cst_30 = arith.constant dense<0.000000e+00> : vector<8xf32>
    %271 = vector.multi_reduction <add>, %270, %cst_30 [0] : vector<16x8xf32> to vector<8xf32>
    %272 = vector.shape_cast %271 : vector<8xf32> to vector<1x8xf32>
    %273 = vector.broadcast %272 : vector<1x8xf32> to vector<16x8xf32>
    %274 = arith.divf %270, %273 : vector<16x8xf32>
    %c6_i32_31 = arith.constant 6 : i32
    %275 = vector.broadcast %c6_i32_31 : i32 to vector<16x8xi32>
    %276 = arith.cmpi eq, %178, %275 : vector<16x8xi32>
    %cst_32 = arith.constant 0.000000e+00 : f32
    %277 = vector.broadcast %cst_32 : f32 to vector<16x8xf32>
    %278 = arith.select %276, %0, %277 : vector<16x8xi1>, vector<16x8xf32>
    %cst_33 = arith.constant dense<0.000000e+00> : vector<8xf32>
    %279 = vector.multi_reduction <add>, %278, %cst_33 [0] : vector<16x8xf32> to vector<8xf32>
    %280 = vector.shape_cast %279 : vector<8xf32> to vector<1x8xf32>
    %281 = vector.broadcast %280 : vector<1x8xf32> to vector<16x8xf32>
    %282 = arith.subf %0, %281 : vector<16x8xf32>
    %283 = math.absf %282 : vector<16x8xf32>
    %cst_34 = arith.constant -1.000000e+00 : f32
    %284 = vector.broadcast %cst_34 : f32 to vector<16x8xf32>
    %285 = arith.mulf %283, %284 : vector<16x8xf32>
    %286 = math.exp %285 : vector<16x8xf32>
    %cst_35 = arith.constant dense<0.000000e+00> : vector<8xf32>
    %287 = vector.multi_reduction <add>, %286, %cst_35 [0] : vector<16x8xf32> to vector<8xf32>
    %288 = vector.shape_cast %287 : vector<8xf32> to vector<1x8xf32>
    %289 = vector.broadcast %288 : vector<1x8xf32> to vector<16x8xf32>
    %290 = arith.divf %286, %289 : vector<16x8xf32>
    %c7_i32_36 = arith.constant 7 : i32
    %291 = vector.broadcast %c7_i32_36 : i32 to vector<16x8xi32>
    %292 = arith.cmpi eq, %178, %291 : vector<16x8xi32>
    %cst_37 = arith.constant 0.000000e+00 : f32
    %293 = vector.broadcast %cst_37 : f32 to vector<16x8xf32>
    %294 = arith.select %292, %0, %293 : vector<16x8xi1>, vector<16x8xf32>
    %cst_38 = arith.constant dense<0.000000e+00> : vector<8xf32>
    %295 = vector.multi_reduction <add>, %294, %cst_38 [0] : vector<16x8xf32> to vector<8xf32>
    %296 = vector.shape_cast %295 : vector<8xf32> to vector<1x8xf32>
    %297 = vector.broadcast %296 : vector<1x8xf32> to vector<16x8xf32>
    %298 = arith.subf %0, %297 : vector<16x8xf32>
    %299 = math.absf %298 : vector<16x8xf32>
    %cst_39 = arith.constant -1.000000e+00 : f32
    %300 = vector.broadcast %cst_39 : f32 to vector<16x8xf32>
    %301 = arith.mulf %299, %300 : vector<16x8xf32>
    %302 = math.exp %301 : vector<16x8xf32>
    %cst_40 = arith.constant dense<0.000000e+00> : vector<8xf32>
    %303 = vector.multi_reduction <add>, %302, %cst_40 [0] : vector<16x8xf32> to vector<8xf32>
    %304 = vector.shape_cast %303 : vector<8xf32> to vector<1x8xf32>
    %305 = vector.broadcast %304 : vector<1x8xf32> to vector<16x8xf32>
    %306 = arith.divf %302, %305 : vector<16x8xf32>
    %307 = tpu.concatenate %194, %210, %226, %242, %258, %274, %290, %306 in 0 : vector<16x8xf32>, vector<16x8xf32>, vector<16x8xf32>, vector<16x8xf32>, vector<16x8xf32>, vector<16x8xf32>, vector<16x8xf32>, vector<16x8xf32> -> vector<128x8xf32>
    %308 = tpu.transpose %307, [1, 0] : vector<128x8xf32> -> vector<8x128xf32>
    %c0_41 = arith.constant 0 : index
    %c0_42 = arith.constant 0 : index
    %309 = vector.load %arg2[%c0_41, %c0_42] : memref<8x256xf32, #tpu.memory_space<vmem>>, vector<8x128xf32>
    tpu.vector_store %arg2[%c0_41, %c0_42], %308 {strides = array<i32>} : memref<8x256xf32, #tpu.memory_space<vmem>>, vector<8x128xf32>,
    %c8_i32_43 = arith.constant 8 : i32
    %310 = vector.broadcast %c8_i32_43 : i32 to vector<16x8xi32>
    %311 = arith.cmpi eq, %178, %310 : vector<16x8xi32>
    %cst_44 = arith.constant 0.000000e+00 : f32
    %312 = vector.broadcast %cst_44 : f32 to vector<16x8xf32>
    %313 = arith.select %311, %0, %312 : vector<16x8xi1>, vector<16x8xf32>
    %cst_45 = arith.constant dense<0.000000e+00> : vector<8xf32>
    %314 = vector.multi_reduction <add>, %313, %cst_45 [0] : vector<16x8xf32> to vector<8xf32>
    %315 = vector.shape_cast %314 : vector<8xf32> to vector<1x8xf32>
    %316 = vector.broadcast %315 : vector<1x8xf32> to vector<16x8xf32>
    %317 = arith.subf %0, %316 : vector<16x8xf32>
    %318 = math.absf %317 : vector<16x8xf32>
    %cst_46 = arith.constant -1.000000e+00 : f32
    %319 = vector.broadcast %cst_46 : f32 to vector<16x8xf32>
    %320 = arith.mulf %318, %319 : vector<16x8xf32>
    %321 = math.exp %320 : vector<16x8xf32>
    %cst_47 = arith.constant dense<0.000000e+00> : vector<8xf32>
    %322 = vector.multi_reduction <add>, %321, %cst_47 [0] : vector<16x8xf32> to vector<8xf32>
    %323 = vector.shape_cast %322 : vector<8xf32> to vector<1x8xf32>
    %324 = vector.broadcast %323 : vector<1x8xf32> to vector<16x8xf32>
    %325 = arith.divf %321, %324 : vector<16x8xf32>
    %c9_i32_48 = arith.constant 9 : i32
    %326 = vector.broadcast %c9_i32_48 : i32 to vector<16x8xi32>
    %327 = arith.cmpi eq, %178, %326 : vector<16x8xi32>
    %cst_49 = arith.constant 0.000000e+00 : f32
    %328 = vector.broadcast %cst_49 : f32 to vector<16x8xf32>
    %329 = arith.select %327, %0, %328 : vector<16x8xi1>, vector<16x8xf32>
    %cst_50 = arith.constant dense<0.000000e+00> : vector<8xf32>
    %330 = vector.multi_reduction <add>, %329, %cst_50 [0] : vector<16x8xf32> to vector<8xf32>
    %331 = vector.shape_cast %330 : vector<8xf32> to vector<1x8xf32>
    %332 = vector.broadcast %331 : vector<1x8xf32> to vector<16x8xf32>
    %333 = arith.subf %0, %332 : vector<16x8xf32>
    %334 = math.absf %333 : vector<16x8xf32>
    %cst_51 = arith.constant -1.000000e+00 : f32
    %335 = vector.broadcast %cst_51 : f32 to vector<16x8xf32>
    %336 = arith.mulf %334, %335 : vector<16x8xf32>
    %337 = math.exp %336 : vector<16x8xf32>
    %cst_52 = arith.constant dense<0.000000e+00> : vector<8xf32>
    %338 = vector.multi_reduction <add>, %337, %cst_52 [0] : vector<16x8xf32> to vector<8xf32>
    %339 = vector.shape_cast %338 : vector<8xf32> to vector<1x8xf32>
    %340 = vector.broadcast %339 : vector<1x8xf32> to vector<16x8xf32>
    %341 = arith.divf %337, %340 : vector<16x8xf32>
    %c10_i32_53 = arith.constant 10 : i32
    %342 = vector.broadcast %c10_i32_53 : i32 to vector<16x8xi32>
    %343 = arith.cmpi eq, %178, %342 : vector<16x8xi32>
    %cst_54 = arith.constant 0.000000e+00 : f32
    %344 = vector.broadcast %cst_54 : f32 to vector<16x8xf32>
    %345 = arith.select %343, %0, %344 : vector<16x8xi1>, vector<16x8xf32>
    %cst_55 = arith.constant dense<0.000000e+00> : vector<8xf32>
    %346 = vector.multi_reduction <add>, %345, %cst_55 [0] : vector<16x8xf32> to vector<8xf32>
    %347 = vector.shape_cast %346 : vector<8xf32> to vector<1x8xf32>
    %348 = vector.broadcast %347 : vector<1x8xf32> to vector<16x8xf32>
    %349 = arith.subf %0, %348 : vector<16x8xf32>
    %350 = math.absf %349 : vector<16x8xf32>
    %cst_56 = arith.constant -1.000000e+00 : f32
    %351 = vector.broadcast %cst_56 : f32 to vector<16x8xf32>
    %352 = arith.mulf %350, %351 : vector<16x8xf32>
    %353 = math.exp %352 : vector<16x8xf32>
    %cst_57 = arith.constant dense<0.000000e+00> : vector<8xf32>
    %354 = vector.multi_reduction <add>, %353, %cst_57 [0] : vector<16x8xf32> to vector<8xf32>
    %355 = vector.shape_cast %354 : vector<8xf32> to vector<1x8xf32>
    %356 = vector.broadcast %355 : vector<1x8xf32> to vector<16x8xf32>
    %357 = arith.divf %353, %356 : vector<16x8xf32>
    %c11_i32_58 = arith.constant 11 : i32
    %358 = vector.broadcast %c11_i32_58 : i32 to vector<16x8xi32>
    %359 = arith.cmpi eq, %178, %358 : vector<16x8xi32>
    %cst_59 = arith.constant 0.000000e+00 : f32
    %360 = vector.broadcast %cst_59 : f32 to vector<16x8xf32>
    %361 = arith.select %359, %0, %360 : vector<16x8xi1>, vector<16x8xf32>
    %cst_60 = arith.constant dense<0.000000e+00> : vector<8xf32>
    %362 = vector.multi_reduction <add>, %361, %cst_60 [0] : vector<16x8xf32> to vector<8xf32>
    %363 = vector.shape_cast %362 : vector<8xf32> to vector<1x8xf32>
    %364 = vector.broadcast %363 : vector<1x8xf32> to vector<16x8xf32>
    %365 = arith.subf %0, %364 : vector<16x8xf32>
    %366 = math.absf %365 : vector<16x8xf32>
    %cst_61 = arith.constant -1.000000e+00 : f32
    %367 = vector.broadcast %cst_61 : f32 to vector<16x8xf32>
    %368 = arith.mulf %366, %367 : vector<16x8xf32>
    %369 = math.exp %368 : vector<16x8xf32>
    %cst_62 = arith.constant dense<0.000000e+00> : vector<8xf32>
    %370 = vector.multi_reduction <add>, %369, %cst_62 [0] : vector<16x8xf32> to vector<8xf32>
    %371 = vector.shape_cast %370 : vector<8xf32> to vector<1x8xf32>
    %372 = vector.broadcast %371 : vector<1x8xf32> to vector<16x8xf32>
    %373 = arith.divf %369, %372 : vector<16x8xf32>
    %c12_i32_63 = arith.constant 12 : i32
    %374 = vector.broadcast %c12_i32_63 : i32 to vector<16x8xi32>
    %375 = arith.cmpi eq, %178, %374 : vector<16x8xi32>
    %cst_64 = arith.constant 0.000000e+00 : f32
    %376 = vector.broadcast %cst_64 : f32 to vector<16x8xf32>
    %377 = arith.select %375, %0, %376 : vector<16x8xi1>, vector<16x8xf32>
    %cst_65 = arith.constant dense<0.000000e+00> : vector<8xf32>
    %378 = vector.multi_reduction <add>, %377, %cst_65 [0] : vector<16x8xf32> to vector<8xf32>
    %379 = vector.shape_cast %378 : vector<8xf32> to vector<1x8xf32>
    %380 = vector.broadcast %379 : vector<1x8xf32> to vector<16x8xf32>
    %381 = arith.subf %0, %380 : vector<16x8xf32>
    %382 = math.absf %381 : vector<16x8xf32>
    %cst_66 = arith.constant -1.000000e+00 : f32
    %383 = vector.broadcast %cst_66 : f32 to vector<16x8xf32>
    %384 = arith.mulf %382, %383 : vector<16x8xf32>
    %385 = math.exp %384 : vector<16x8xf32>
    %cst_67 = arith.constant dense<0.000000e+00> : vector<8xf32>
    %386 = vector.multi_reduction <add>, %385, %cst_67 [0] : vector<16x8xf32> to vector<8xf32>
    %387 = vector.shape_cast %386 : vector<8xf32> to vector<1x8xf32>
    %388 = vector.broadcast %387 : vector<1x8xf32> to vector<16x8xf32>
    %389 = arith.divf %385, %388 : vector<16x8xf32>
    %c13_i32_68 = arith.constant 13 : i32
    %390 = vector.broadcast %c13_i32_68 : i32 to vector<16x8xi32>
    %391 = arith.cmpi eq, %178, %390 : vector<16x8xi32>
    %cst_69 = arith.constant 0.000000e+00 : f32
    %392 = vector.broadcast %cst_69 : f32 to vector<16x8xf32>
    %393 = arith.select %391, %0, %392 : vector<16x8xi1>, vector<16x8xf32>
    %cst_70 = arith.constant dense<0.000000e+00> : vector<8xf32>
    %394 = vector.multi_reduction <add>, %393, %cst_70 [0] : vector<16x8xf32> to vector<8xf32>
    %395 = vector.shape_cast %394 : vector<8xf32> to vector<1x8xf32>
    %396 = vector.broadcast %395 : vector<1x8xf32> to vector<16x8xf32>
    %397 = arith.subf %0, %396 : vector<16x8xf32>
    %398 = math.absf %397 : vector<16x8xf32>
    %cst_71 = arith.constant -1.000000e+00 : f32
    %399 = vector.broadcast %cst_71 : f32 to vector<16x8xf32>
    %400 = arith.mulf %398, %399 : vector<16x8xf32>
    %401 = math.exp %400 : vector<16x8xf32>
    %cst_72 = arith.constant dense<0.000000e+00> : vector<8xf32>
    %402 = vector.multi_reduction <add>, %401, %cst_72 [0] : vector<16x8xf32> to vector<8xf32>
    %403 = vector.shape_cast %402 : vector<8xf32> to vector<1x8xf32>
    %404 = vector.broadcast %403 : vector<1x8xf32> to vector<16x8xf32>
    %405 = arith.divf %401, %404 : vector<16x8xf32>
    %c14_i32_73 = arith.constant 14 : i32
    %406 = vector.broadcast %c14_i32_73 : i32 to vector<16x8xi32>
    %407 = arith.cmpi eq, %178, %406 : vector<16x8xi32>
    %cst_74 = arith.constant 0.000000e+00 : f32
    %408 = vector.broadcast %cst_74 : f32 to vector<16x8xf32>
    %409 = arith.select %407, %0, %408 : vector<16x8xi1>, vector<16x8xf32>
    %cst_75 = arith.constant dense<0.000000e+00> : vector<8xf32>
    %410 = vector.multi_reduction <add>, %409, %cst_75 [0] : vector<16x8xf32> to vector<8xf32>
    %411 = vector.shape_cast %410 : vector<8xf32> to vector<1x8xf32>
    %412 = vector.broadcast %411 : vector<1x8xf32> to vector<16x8xf32>
    %413 = arith.subf %0, %412 : vector<16x8xf32>
    %414 = math.absf %413 : vector<16x8xf32>
    %cst_76 = arith.constant -1.000000e+00 : f32
    %415 = vector.broadcast %cst_76 : f32 to vector<16x8xf32>
    %416 = arith.mulf %414, %415 : vector<16x8xf32>
    %417 = math.exp %416 : vector<16x8xf32>
    %cst_77 = arith.constant dense<0.000000e+00> : vector<8xf32>
    %418 = vector.multi_reduction <add>, %417, %cst_77 [0] : vector<16x8xf32> to vector<8xf32>
    %419 = vector.shape_cast %418 : vector<8xf32> to vector<1x8xf32>
    %420 = vector.broadcast %419 : vector<1x8xf32> to vector<16x8xf32>
    %421 = arith.divf %417, %420 : vector<16x8xf32>
    %c15_i32_78 = arith.constant 15 : i32
    %422 = vector.broadcast %c15_i32_78 : i32 to vector<16x8xi32>
    %423 = arith.cmpi eq, %178, %422 : vector<16x8xi32>
    %cst_79 = arith.constant 0.000000e+00 : f32
    %424 = vector.broadcast %cst_79 : f32 to vector<16x8xf32>
    %425 = arith.select %423, %0, %424 : vector<16x8xi1>, vector<16x8xf32>
    %cst_80 = arith.constant dense<0.000000e+00> : vector<8xf32>
    %426 = vector.multi_reduction <add>, %425, %cst_80 [0] : vector<16x8xf32> to vector<8xf32>
    %427 = vector.shape_cast %426 : vector<8xf32> to vector<1x8xf32>
    %428 = vector.broadcast %427 : vector<1x8xf32> to vector<16x8xf32>
    %429 = arith.subf %0, %428 : vector<16x8xf32>
    %430 = math.absf %429 : vector<16x8xf32>
    %cst_81 = arith.constant -1.000000e+00 : f32
    %431 = vector.broadcast %cst_81 : f32 to vector<16x8xf32>
    %432 = arith.mulf %430, %431 : vector<16x8xf32>
    %433 = math.exp %432 : vector<16x8xf32>
    %cst_82 = arith.constant dense<0.000000e+00> : vector<8xf32>
    %434 = vector.multi_reduction <add>, %433, %cst_82 [0] : vector<16x8xf32> to vector<8xf32>
    %435 = vector.shape_cast %434 : vector<8xf32> to vector<1x8xf32>
    %436 = vector.broadcast %435 : vector<1x8xf32> to vector<16x8xf32>
    %437 = arith.divf %433, %436 : vector<16x8xf32>
    %438 = tpu.concatenate %325, %341, %357, %373, %389, %405, %421, %437 in 0 : vector<16x8xf32>, vector<16x8xf32>, vector<16x8xf32>, vector<16x8xf32>, vector<16x8xf32>, vector<16x8xf32>, vector<16x8xf32>, vector<16x8xf32> -> vector<128x8xf32>
    %439 = tpu.transpose %438, [1, 0] : vector<128x8xf32> -> vector<8x128xf32>
    %c0_83 = arith.constant 0 : index
    %c128 = arith.constant 128 : index
    %440 = vector.load %arg2[%c0_83, %c128] : memref<8x256xf32, #tpu.memory_space<vmem>>, vector<8x128xf32>
    tpu.vector_store %arg2[%c0_83, %c128], %439 {strides = array<i32>} : memref<8x256xf32, #tpu.memory_space<vmem>>, vector<8x128xf32>,
    return
  }
  func.func @transform_0(%arg0: i32) -> (i32, i32) {
    %c0_i32 = arith.constant 0 : i32
    %c0_i32_0 = arith.constant 0 : i32
    return %c0_i32, %arg0 : i32, i32
  }
  func.func @transform_1(%arg0: i32) -> (i32, i32) {
    %c0_i32 = arith.constant 0 : i32
    %c0_i32_0 = arith.constant 0 : i32
    return %arg0, %c0_i32 : i32, i32
  }
}

</mosaic_0001>

<bundles_post_ra>
// kernel: tpu_custom_call.1
= control target key start
LH: loop header
LB: loop body
LE: loop exit
PB: predicated region body
PF: predicated region fallthrough
CT: control target
= control target key end

     0   :  { %v11_v0 = vlaneseq  ;;  %s1623_s0 = inlined_call_operand.vmem [shape: f32[16,8], index: 0, kind: input, shape index: {}]   ;;  %s1624_s1 = inlined_call_operand.hbm [shape: f32[8,256], index: 1, kind: output, shape index: {}]  }
   0x1   :  { %6 = vsyncpa [#allocation3], 0  ;;  %v1082_v2 = vld [vmem:[%s1623_s0] sm:$0xff]  ;;  %v1089_v5 = vld [vmem:[%s1623_s0 + $0x8] sm:$0xff]  ;;  %v1065_v14 = vmov 0  }
   0x2   :  { %v1077_v1 = vshrl.u32 %v11_v0, 7 }
   0x4   :  { %v16_v3 = vsub.s32 0, %v1077_v1  ;;  %v32_v4 = vsub.s32 1, %v1077_v1  ;;  %v50_v6 = vsub.s32 2, %v1077_v1  ;;  %vm22_vm0 = vcmp.gt.s32.totalorder %v1077_v1, 0 }
   0x5   :  { %v68_v9 = vsub.s32 3, %v1077_v1  ;;  %vm38_vm7 = vcmp.gt.s32.totalorder %v1077_v1, 1  ;;  %v86_v12 = vsub.s32 4, %v1077_v1  ;;  %v1115_v13 = vadd.s32 8, %v1077_v1 }
   0x6   :  { %v17_v7 = vrot.slane %v1082_v2, %v16_v3  ;;  %v33_v8 = vrot.slane %v1082_v2, %v32_v4  ;;  %v51_v10 = vrot.slane %v1082_v2, %v50_v6  ;;  %vm56_vm15 = vcmp.gt.s32.totalorder %v1077_v1, 2 }
   0x7   :  { %v69_v11 = vrot.slane %v1082_v2, %v68_v9  ;;  %v104_v16 = vsub.s32 5, %v1077_v1  ;;  %v87_v19 = vrot.slane %v1082_v2, %v86_v12  ;;  %v122_v22 = vsub.s32 6, %v1077_v1 }
   0x8   :  { %vm18_vm1 = vcmp.gt.f32.partialorder %v17_v7, %v1082_v2  ;;  %vm19_vm2 = vcmp.gt.f32.partialorder %v17_v7, %v1089_v5  ;;  %vm20_vm3 = vcmp.eq.f32.partialorder %v17_v7, %v1082_v2  ;;  %vm21_vm4 = vcmp.eq.f32.partialorder %v17_v7, %v1089_v5 }
   0x9   :  { %vm24_vm5 = vmand %vm20_vm3, %vm22_vm0  ;;  %vm36_vm6 = vcmp.eq.f32.partialorder %v33_v8, %v1082_v2  ;;  %vm34_vm9 = vcmp.gt.f32.partialorder %v33_v8, %v1082_v2  ;;  %vm35_vm11 = vcmp.gt.f32.partialorder %v33_v8, %v1089_v5  ;;  %vm37_vm12 = vcmp.eq.f32.partialorder %v33_v8, %v1089_v5 }
   0xa   :  { %vm26_vm8 = vmor %vm18_vm1, %vm24_vm5  ;;  %vm54_vm14 = vcmp.eq.f32.partialorder %v51_v10, %v1082_v2  ;;  %vm52_vm1 = vcmp.gt.f32.partialorder %v51_v10, %v1082_v2  ;;  %vm74_vm3 = vcmp.gt.s32.totalorder %v1077_v1, 3  ;;  %vm55_vm5 = vcmp.eq.f32.partialorder %v51_v10, %v1089_v5 }
   0xb   :  { %vm27_vm10 = vmor %vm19_vm2, %vm21_vm4  ;;  %v28_v15 = vsel %vm26_vm8, 1, %v1065_v14  ;;  %vm53_vm2 = vcmp.gt.f32.partialorder %v51_v10, %v1089_v5  ;;  %v140_v23 = vsub.s32 7, %v1077_v1  ;;  %v105_v25 = vrot.slane %v1082_v2, %v104_v16 }
   0xc   :  { %vm40_vm13 = vmand %vm36_vm6, %vm38_vm7  ;;  %v29_v17 = vsel %vm27_vm10, 1, %v1065_v14  ;;  %vm72_vm6 = vcmp.eq.f32.partialorder %v69_v11, %v1082_v2  ;;  %vm92_vm10 = vcmp.gt.s32.totalorder %v1077_v1, 4  ;;  %v123_v30 = vrot.slane %v1082_v2, %v122_v22 }
   0xd   :  { %vm42_vm0 = vmor %vm34_vm9, %vm40_vm13  ;;  %vm70_vm9 = vcmp.gt.f32.partialorder %v69_v11, %v1082_v2  ;;  %vm73_vm13 = vcmp.eq.f32.partialorder %v69_v11, %v1089_v5  ;;  %v141_v31 = vrot.slane %v1082_v2, %v140_v23  ;;  %v159_v36 = vrot.slane %v1089_v5, %v16_v3 }
   0xe   :  { %vm43_vm4 = vmor %vm35_vm11, %vm37_vm12  ;;  %v44_v18 = vsel %vm42_vm0, 1, %v1065_v14  ;;  %vm71_vm12 = vcmp.gt.f32.partialorder %v69_v11, %v1089_v5  ;;  %vm90_vm0 = vcmp.eq.f32.partialorder %v87_v19, %v1082_v2  ;;  %v177_v38 = vrot.slane %v1089_v5, %v32_v4 }
   0xf   :  { %v45_v20 = vsel %vm43_vm4, 1, %v1065_v14  ;;  %v46_v21 = vadd.s32 %v44_v18, %v28_v15  ;;  %vm58_vm7 = vmand %vm54_vm14, %vm56_vm15  ;;  %vm110_vm14 = vcmp.gt.s32.totalorder %v1077_v1, 5  ;;  %vm88_vm4 = vcmp.gt.f32.partialorder %v87_v19, %v1082_v2 }
  0x10   :  { %v47_v24 = vadd.s32 %v45_v20, %v29_v17  ;;  %vm60_vm8 = vmor %vm52_vm1, %vm58_vm7  ;;  %vm128_vm1 = vcmp.gt.s32.totalorder %v1077_v1, 6  ;;  %vm106_vm7 = vcmp.gt.f32.partialorder %v105_v25, %v1082_v2  ;;  %v195_v48 = vrot.slane %v1089_v5, %v50_v6 }
  0x11   :  { %vm61_vm11 = vmor %vm53_vm2, %vm55_vm5  ;;  %v62_v26 = vsel %vm60_vm8, 1, %v1065_v14  ;;  %v213_v53 = vrot.slane %v1089_v5, %v68_v9  ;;  %v231_v57 = vrot.slane %v1089_v5, %v86_v12  ;;  %v249_v62 = vrot.slane %v1089_v5, %v104_v16 }
  0x12   :  { %v63_v27 = vsel %vm61_vm11, 1, %v1065_v14  ;;  %v64_v28 = vadd.s32 %v62_v26, %v46_v21  ;;  %vm76_vm15 = vmand %vm72_vm6, %vm74_vm3  ;;  %vm89_vm3 = vcmp.gt.f32.partialorder %v87_v19, %v1089_v5  ;;  %vm91_vm6 = vcmp.eq.f32.partialorder %v87_v19, %v1089_v5 }
  0x13   :  { %v65_v29 = vadd.s32 %v63_v27, %v47_v24  ;;  %vm78_vm2 = vmor %vm70_vm9, %vm76_vm15  ;;  %vm107_vm9 = vcmp.gt.f32.partialorder %v105_v25, %v1089_v5  ;;  %vm108_vm11 = vcmp.eq.f32.partialorder %v105_v25, %v1082_v2  ;;  %vm160_vm15 = vcmp.gt.f32.partialorder %v159_v36, %v1082_v2 }
  0x14   :  { %vm79_vm5 = vmor %vm71_vm12, %vm73_vm13  ;;  %v80_v32 = vsel %vm78_vm2, 1, %v1065_v14  ;;  %vm109_vm13 = vcmp.eq.f32.partialorder %v105_v25, %v1089_v5  ;;  %v170_v47 = vsel %vm160_vm15, 1, %v1065_v14  ;;  %vm1625_vm15 = vcmp.gt.f32.partialorder %v141_v31, %v1089_v5 }
  0x15   :  { %v81_v33 = vsel %vm79_vm5, 1, %v1065_v14  ;;  %v82_v34 = vadd.s32 %v80_v32, %v64_v28  ;;  %vm94_vm8 = vmand %vm90_vm0, %vm92_vm10  ;;  %vm124_vm5 = vcmp.gt.f32.partialorder %v123_v30, %v1082_v2  ;;  %vm142_vm10 = vcmp.gt.f32.partialorder %v141_v31, %v1082_v2 }
  0x16   :  { %v83_v35 = vadd.s32 %v81_v33, %v65_v29  ;;  %vm96_vm12 = vmor %vm88_vm4, %vm94_vm8  ;;  %vm125_vm4 = vcmp.gt.f32.partialorder %v123_v30, %v1089_v5  ;;  %vm127_vm8 = vcmp.eq.f32.partialorder %v123_v30, %v1089_v5  ;;  %v152_v43 = vsel %vm142_vm10, 1, %v1065_v14 }
  0x17   :  { %vm97_vm2 = vmor %vm89_vm3, %vm91_vm6  ;;  %v98_v37 = vsel %vm96_vm12, 1, %v1065_v14  ;;  %vm126_vm3 = vcmp.eq.f32.partialorder %v123_v30, %v1082_v2  ;;  %vm163_vm12 = vcmp.eq.f32.partialorder %v159_v36, %v1089_v5  ;;  %vm181_vm10 = vcmp.eq.f32.partialorder %v177_v38, %v1089_v5 }
  0x18   :  { %v99_v39 = vsel %vm97_vm2, 1, %v1065_v14  ;;  %v100_v40 = vadd.s32 %v98_v37, %v82_v34  ;;  %vm112_vm0 = vmand %vm108_vm11, %vm110_vm14  ;;  %vm145_vm14 = vcmp.eq.f32.partialorder %v141_v31, %v1089_v5  ;;  %vm178_vm11 = vcmp.gt.f32.partialorder %v177_v38, %v1082_v2 }
  0x19   :  { %v101_v41 = vadd.s32 %v99_v39, %v83_v35  ;;  %vm114_vm6 = vmor %vm106_vm7, %vm112_vm0  ;;  %vm161_vm0 = vcmp.gt.f32.partialorder %v159_v36, %v1089_v5  ;;  %v188_v50 = vsel %vm178_vm11, 1, %v1065_v14  ;;  %vm219_vm11 = vcmp.gt.s32.totalorder %v1115_v13, 11 }
  0x1a   :  { %vm115_vm2 = vmor %vm107_vm9, %vm109_vm13  ;;  %v116_v42 = vsel %vm114_vm6, 1, %v1065_v14  ;;  %vm179_vm13 = vcmp.gt.f32.partialorder %v177_v38, %v1089_v5  ;;  %vm196_vm6 = vcmp.gt.f32.partialorder %v195_v48, %v1082_v2  ;;  %v267_v6 = vrot.slane %v1089_v5, %v122_v22 }
  0x1b   :  { %v117_v44 = vsel %vm115_vm2, 1, %v1065_v14  ;;  %v118_v45 = vadd.s32 %v116_v42, %v100_v40  ;;  %vm130_vm7 = vmand %vm126_vm3, %vm128_vm1  ;;  %vm183_vm3 = vcmp.gt.s32.totalorder %v1115_v13, 9  ;;  %vm201_vm2 = vcmp.gt.s32.totalorder %v1115_v13, 10 }
  0x1c   :  { %v119_v46 = vadd.s32 %v117_v44, %v101_v41  ;;  %vm132_vm9 = vmor %vm124_vm5, %vm130_vm7  ;;  %vm199_vm7 = vcmp.eq.f32.partialorder %v195_v48, %v1089_v5  ;;  %v206_v60 = vsel %vm196_vm6, 1, %v1065_v14  ;;  %vm235_vm6 = vcmp.eq.f32.partialorder %v231_v57, %v1089_v5 }
  0x1d   :  { %vm133_vm1 = vmor %vm125_vm4, %vm127_vm8  ;;  %v134_v49 = vsel %vm132_vm9, 1, %v1065_v14  ;;  %vm1626_vm4 = vcmp.gt.s32.totalorder %v1115_v13, 8  ;;  %vm214_vm9 = vcmp.gt.f32.partialorder %v213_v53, %v1082_v2  ;;  %v285_v10 = vrot.slane %v1089_v5, %v140_v23 }
  0x1e   :  { %v135_v51 = vsel %vm133_vm1, 1, %v1065_v14  ;;  %v136_v52 = vadd.s32 %v134_v49, %v118_v45  ;;  %vm151_vm5 = vmor %vm1625_vm15, %vm145_vm14  ;;  %vm197_vm1 = vcmp.gt.f32.partialorder %v195_v48, %v1089_v5  ;;  %vm215_vm15 = vcmp.gt.f32.partialorder %v213_v53, %v1089_v5 }
  0x1f   :  { %v137_v54 = vadd.s32 %v135_v51, %v119_v46  ;;  %v153_v55 = vsel %vm151_vm5, 1, %v1065_v14  ;;  %vm167_vm8 = vmand %vm163_vm12, %vm1626_vm4  ;;  %vm217_vm5 = vcmp.eq.f32.partialorder %v213_v53, %v1089_v5  ;;  %v224_v3 = vsel %vm214_vm9, 1, %v1065_v14 }
  0x20   :  { %v154_v56 = vadd.s32 %v152_v43, %v136_v52  ;;  %vm169_vm14 = vmor %vm161_vm0, %vm167_vm8  ;;  %vm237_vm4 = vcmp.gt.s32.totalorder %v1115_v13, 12  ;;  %vm250_vm9 = vcmp.gt.f32.partialorder %v249_v62, %v1082_v2 }
  0x21   :  { %v155_v58 = vadd.s32 %v153_v55, %v137_v54  ;;  %v171_v59 = vsel %vm169_vm14, 1, %v1065_v14  ;;  %vm185_vm12 = vmand %vm181_vm10, %vm183_vm3  ;;  %vm255_vm14 = vcmp.gt.s32.totalorder %v1115_v13, 13  ;;  %v260_v18 = vsel %vm250_vm9, 1, %v1065_v14 }
  0x22   :  { %v172_v61 = vadd.s32 %v170_v47, %v154_v56  ;;  %vm187_vm0 = vmor %vm179_vm13, %vm185_vm12  ;;  %vm232_vm13 = vcmp.gt.f32.partialorder %v231_v57, %v1082_v2  ;;  %vm253_vm12 = vcmp.eq.f32.partialorder %v249_v62, %v1089_v5 }
  0x23   :  { %v173_v63 = vadd.s32 %v171_v59, %v155_v58  ;;  %v189_v0 = vsel %vm187_vm0, 1, %v1065_v14  ;;  %vm203_vm10 = vmand %vm199_vm7, %vm201_vm2  ;;  %vm233_vm2 = vcmp.gt.f32.partialorder %v231_v57, %v1089_v5  ;;  %v242_v15 = vsel %vm232_vm13, 1, %v1065_v14 }
  0x24   :  { %v190_v4 = vadd.s32 %v188_v50, %v172_v61  ;;  %vm205_vm3 = vmor %vm197_vm1, %vm203_vm10  ;;  %vm251_vm1 = vcmp.gt.f32.partialorder %v249_v62, %v1089_v5  ;;  %vm273_vm10 = vcmp.gt.s32.totalorder %v1115_v13, 14  ;;  %vm269_vm13 = vcmp.gt.f32.partialorder %v267_v6, %v1089_v5 }
  0x25   :  { %v191_v7 = vadd.s32 %v189_v0, %v173_v63  ;;  %v207_v8 = vsel %vm205_vm3, 1, %v1065_v14  ;;  %vm221_vm8 = vmand %vm217_vm5, %vm219_vm11  ;;  %vm271_vm5 = vcmp.eq.f32.partialorder %v267_v6, %v1089_v5 }
  0x26   :  { %v208_v9 = vadd.s32 %v206_v60, %v190_v4  ;;  %vm223_vm7 = vmor %vm215_vm15, %vm221_vm8  ;;  %vm268_vm15 = vcmp.gt.f32.partialorder %v267_v6, %v1082_v2 }
  0x27   :  { %v209_v11 = vadd.s32 %v207_v8, %v191_v7  ;;  %v225_v12 = vsel %vm223_vm7, 1, %v1065_v14  ;;  %vm239_vm11 = vmand %vm235_vm6, %vm237_vm4  ;;  %vm286_vm4 = vcmp.gt.f32.partialorder %v285_v10, %v1082_v2  ;;  %v278_v22 = vsel %vm268_vm15, 1, %v1065_v14 }
  0x28   :  { %v226_v16 = vadd.s32 %v224_v3, %v208_v9  ;;  %vm241_vm0 = vmor %vm233_vm2, %vm239_vm11  ;;  %vm287_vm2 = vcmp.gt.f32.partialorder %v285_v10, %v1089_v5  ;;  %v296_v25 = vsel %vm286_vm4, 1, %v1065_v14  ;;  %vm304_vm7 = vcmask 64512  }
  0x29   :  { %v227_v1 = vadd.s32 %v225_v12, %v209_v11  ;;  %v243_v17 = vsel %vm241_vm0, 1, %v1065_v14  ;;  %vm257_vm3 = vmand %vm253_vm12, %vm255_vm14  ;;  %v297_v27 = vsel %vm287_vm2, 1, %v1065_v14 }
  0x2a   :  { %v244_v19 = vadd.s32 %v242_v15, %v226_v16  ;;  %vm259_vm6 = vmor %vm251_vm1, %vm257_vm3 }
  0x2b   :  { %v245_v20 = vadd.s32 %v243_v17, %v227_v1  ;;  %v261_v21 = vsel %vm259_vm6, 1, %v1065_v14  ;;  %vm275_vm8 = vmand %vm271_vm5, %vm273_vm10 }
  0x2c   :  { %v262_v13 = vadd.s32 %v260_v18, %v244_v19  ;;  %vm277_vm14 = vmor %vm269_vm13, %vm275_vm8 }
  0x2d   :  { %v263_v23 = vadd.s32 %v261_v21, %v245_v20  ;;  %v279_v24 = vsel %vm277_vm14, 1, %v1065_v14 }
  0x2e   :  { %v280_v26 = vadd.s32 %v278_v22, %v262_v13 }
  0x2f   :  { %v281_v28 = vadd.s32 %v279_v24, %v263_v23 }
  0x30   :  { %v1310_v29 = vadd.s32 %v296_v25, %v280_v26 }
  0x31   :  { %v1312_v30 = vadd.s32 %v297_v27, %v281_v28 }
  0x32   :  { %vm614_vm9 = vcmp.eq.s32.totalorder %v1310_v29, 8  ;;  %vm300_vm12 = vcmp.eq.s32.totalorder %v1310_v29, 0  ;;  %vm649_vm11 = vcmp.eq.s32.totalorder %v1310_v29, 9  ;;  %vm336_vm1 = vcmp.eq.s32.totalorder %v1310_v29, 1 }
  0x33   :  { %vm615_vm0 = vcmp.eq.s32.totalorder %v1312_v30, 8  ;;  %v616_v31 = vsel %vm614_vm9, %v1082_v2, 0.0  ;;  %vm301_vm15 = vcmp.eq.s32.totalorder %v1312_v30, 0  ;;  %v302_v14 = vsel %vm300_vm12, %v1082_v2, 0.0 }
  0x34   :  { %v617_v32 = vsel %vm615_vm0, %v1089_v5, 0.0  ;;  %v618_v33 = vsel %vm304_vm7, %v616_v31, 0.0  ;;  %v303_v34 = vsel %vm301_vm15, %v1089_v5, 0.0  ;;  %v305_v35 = vsel %vm304_vm7, %v302_v14, 0.0 }
  0x35   :  { %v619_v36 = vsel %vm304_vm7, %v617_v32, 0.0  ;;  %v306_v37 = vsel %vm304_vm7, %v303_v34, 0.0  ;;  %vm650_vm5 = vcmp.eq.s32.totalorder %v1312_v30, 9  ;;  %v651_v38 = vsel %vm649_vm11, %v1082_v2, 0.0 }
  0x36   :  { %v620_v39 = vadd.f32 %v619_v36, %v618_v33  ;;  %v307_v40 = vadd.f32 %v306_v37, %v305_v35  ;;  %v652_v41 = vsel %vm650_vm5, %v1089_v5, 0.0  ;;  %v653_v42 = vsel %vm304_vm7, %v651_v38, 0.0 }
  0x37   :  { %v654_v43 = vsel %vm304_vm7, %v652_v41, 0.0  ;;  %vm337_vm10 = vcmp.eq.s32.totalorder %v1312_v30, 1  ;;  %v338_v44 = vsel %vm336_vm1, %v1082_v2, 0.0  ;;  %vm684_vm3 = vcmp.eq.s32.totalorder %v1310_v29, 10 }
  0x38   :  { %v621_v45 = vrot.slane %v620_v39, 4  ;;  %v308_v46 = vrot.slane %v307_v40, 4  ;;  %v655_v47 = vadd.f32 %v654_v43, %v653_v42  ;;  %v339_v48 = vsel %vm337_vm10, %v1089_v5, 0.0 }
  0x39   :  { %v340_v49 = vsel %vm304_vm7, %v338_v44, 0.0  ;;  %v341_v50 = vsel %vm304_vm7, %v339_v48, 0.0  ;;  %vm685_vm13 = vcmp.eq.s32.totalorder %v1312_v30, 10  ;;  %v686_v51 = vsel %vm684_vm3, %v1082_v2, 0.0 }
  0x3a   :  { %v622_v52 = vadd.f32 %v621_v45, %v620_v39  ;;  %v309_v53 = vadd.f32 %v308_v46, %v307_v40  ;;  %v656_v54 = vrot.slane %v655_v47, 4  ;;  %v342_v55 = vadd.f32 %v341_v50, %v340_v49 }
  0x3b   :  { %v687_v56 = vsel %vm685_vm13, %v1089_v5, 0.0  ;;  %v688_v57 = vsel %vm304_vm7, %v686_v51, 0.0  ;;  %vm371_vm6 = vcmp.eq.s32.totalorder %v1310_v29, 2  ;;  %vm372_vm4 = vcmp.eq.s32.totalorder %v1312_v30, 2 }
  0x3c   :  { %v623_v58 = vrot.slane %v622_v52, 2  ;;  %v310_v59 = vrot.slane %v309_v53, 2  ;;  %v657_v60 = vadd.f32 %v656_v54, %v655_v47  ;;  %v343_v61 = vrot.slane %v342_v55, 4 }
  0x3d   :  { %v689_v62 = vsel %vm304_vm7, %v687_v56, 0.0  ;;  %v373_v63 = vsel %vm371_vm6, %v1082_v2, 0.0  ;;  %v374_v0 = vsel %vm372_vm4, %v1089_v5, 0.0  ;;  %vm719_vm8 = vcmp.eq.s32.totalorder %v1310_v29, 11 }
  0x3e   :  { %v624_v3 = vadd.f32 %v623_v58, %v622_v52  ;;  %v311_v4 = vadd.f32 %v310_v59, %v309_v53  ;;  %v658_v6 = vrot.slane %v657_v60, 2  ;;  %v344_v7 = vadd.f32 %v343_v61, %v342_v55 }
  0x3f   :  { %v690_v8 = vadd.f32 %v689_v62, %v688_v57  ;;  %v375_v9 = vsel %vm304_vm7, %v373_v63, 0.0  ;;  %v376_v10 = vsel %vm304_vm7, %v374_v0, 0.0  ;;  %vm720_vm2 = vcmp.eq.s32.totalorder %v1312_v30, 11 }
  0x40   :  { %v625_v11 = vrot.slane %v624_v3, 1  ;;  %v312_v12 = vrot.slane %v311_v4, 1  ;;  %v659_v15 = vadd.f32 %v658_v6, %v657_v60  ;;  %v345_v16 = vrot.slane %v344_v7, 2 }
  0x41   :  { %v691_v1 = vrot.slane %v690_v8, 4  ;;  %v377_v17 = vadd.f32 %v376_v10, %v375_v9  ;;  %v721_v18 = vsel %vm719_vm8, %v1082_v2, 0.0  ;;  %v722_v19 = vsel %vm720_vm2, %v1089_v5, 0.0 }
  0x42   :  { %v626_v20 = vadd.f32 %v625_v11, %v624_v3  ;;  %v313_v21 = vadd.f32 %v312_v12, %v311_v4  ;;  %v660_v22 = vrot.slane %v659_v15, 1  ;;  %v346_v13 = vadd.f32 %v345_v16, %v344_v7 }
  0x43   :  { %v692_v23 = vadd.f32 %v691_v1, %v690_v8  ;;  %v378_v24 = vrot.slane %v377_v17, 4  ;;  %v723_v25 = vsel %vm304_vm7, %v721_v18, 0.0  ;;  %v724_v26 = vsel %vm304_vm7, %v722_v19, 0.0 }
  0x44   :  { %v627_v27 = vsub.f32 %v1082_v2, %v626_v20  ;;  %v628_v28 = vsub.f32 %v1089_v5, %v626_v20  ;;  %v314_v31 = vsub.f32 %v1082_v2, %v313_v21  ;;  %v315_v14 = vsub.f32 %v1089_v5, %v313_v21 }
  0x45   :  { %v661_v32 = vadd.f32 %v660_v22, %v659_v15  ;;  %v347_v33 = vrot.slane %v346_v13, 1  ;;  %v693_v34 = vrot.slane %v692_v23, 2  ;;  %v379_v35 = vadd.f32 %v378_v24, %v377_v17 }
  0x46   :  { %v629_v36 = vand.u32 2147483647, %v627_v27  ;;  %v630_v37 = vand.u32 2147483647, %v628_v28  ;;  %v316_v38 = vand.u32 2147483647, %v314_v31  ;;  %v725_v39 = vadd.f32 %v724_v26, %v723_v25 }
  0x47   :  { %v317_v40 = vand.u32 2147483647, %v315_v14  ;;  %v662_v41 = vsub.f32 %v1082_v2, %v661_v32  ;;  %v663_v42 = vsub.f32 %v1089_v5, %v661_v32  ;;  %v348_v43 = vadd.f32 %v347_v33, %v346_v13 }
  0x48   :  { %v631_v44 = vmul.f32 -1.0, %v629_v36  ;;  %v632_v45 = vmul.f32 -1.0, %v630_v37  ;;  %v318_v46 = vmul.f32 -1.0, %v316_v38  ;;  %v694_v47 = vadd.f32 %v693_v34, %v692_v23 }
  0x49   :  { %v319_v48 = vmul.f32 -1.0, %v317_v40  ;;  %v664_v49 = vand.u32 2147483647, %v662_v41  ;;  %v665_v50 = vand.u32 2147483647, %v663_v42  ;;  %v349_v51 = vsub.f32 %v1082_v2, %v348_v43 }
  0x4a   :  { %v633_v52 = vmul.f32 1.442695, %v631_v44  ;;  %v635_v53 = vmul.f32 1.442695, %v632_v45  ;;  %v320_v54 = vmul.f32 1.442695, %v318_v46  ;;  %v350_v55 = vsub.f32 %v1089_v5, %v348_v43 }
  0x4b   :  { %v322_v56 = vmul.f32 1.442695, %v319_v48  ;;  %v666_v57 = vmul.f32 -1.0, %v664_v49  ;;  %v667_v58 = vmul.f32 -1.0, %v665_v50  ;;  %v351_v59 = vand.u32 2147483647, %v349_v51 }
  0x4c   :  { %943 = vpow2.f32 %v633_v52  ;;  %v352_v60 = vand.u32 2147483647, %v350_v55  ;;  %v695_v61 = vrot.slane %v694_v47, 1  ;;  %v380_v62 = vrot.slane %v379_v35, 2 }
  0x4d   :  { %945 = vpow2.f32 %v635_v53  ;;  %v668_v63 = vmul.f32 1.442695, %v666_v57  ;;  %v670_v0 = vmul.f32 1.442695, %v667_v58  ;;  %v353_v3 = vmul.f32 -1.0, %v351_v59 }
  0x4e   :  { %947 = vpow2.f32 %v320_v54  ;;  %v354_v4 = vmul.f32 -1.0, %v352_v60  ;;  %v696_v6 = vadd.f32 %v695_v61, %v694_v47  ;;  %v381_v7 = vadd.f32 %v380_v62, %v379_v35 }
  0x4f   :  { %949 = vpow2.f32 %v322_v56  ;;  %v355_v8 = vmul.f32 1.442695, %v353_v3  ;;  %v726_v9 = vrot.slane %v725_v39, 4  ;;  %vm406_vm14 = vcmp.eq.s32.totalorder %v1310_v29, 3 }
  0x50   :  { %951 = vpow2.f32 %v668_v63  ;;  %v357_v10 = vmul.f32 1.442695, %v354_v4  ;;  %v697_v11 = vsub.f32 %v1082_v2, %v696_v6  ;;  %v698_v12 = vsub.f32 %v1089_v5, %v696_v6 }
  0x51   :  { %953 = vpow2.f32 %v670_v0  ;;  %v382_v15 = vrot.slane %v381_v7, 1  ;;  %v727_v16 = vadd.f32 %v726_v9, %v725_v39  ;;  %vm407_vm9 = vcmp.eq.s32.totalorder %v1312_v30, 3 }
  0x52   :  { %955 = vpow2.f32 %v355_v8  ;;  %v699_v1 = vand.u32 2147483647, %v697_v11  ;;  %v700_v17 = vand.u32 2147483647, %v698_v12  ;;  %v408_v18 = vsel %vm406_vm14, %v1082_v2, 0.0 }
  0x53   :  { %957 = vpow2.f32 %v357_v10  ;;  %v383_v19 = vadd.f32 %v382_v15, %v381_v7  ;;  %v728_v20 = vrot.slane %v727_v16, 2  ;;  %v409_v21 = vsel %vm407_vm9, %v1089_v5, 0.0 }
  0x54   :  { %v701_v22 = vmul.f32 -1.0, %v699_v1  ;;  %v702_v13 = vmul.f32 -1.0, %v700_v17  ;;  %v410_v23 = vsel %vm304_vm7, %v408_v18, 0.0  ;;  %v411_v24 = vsel %vm304_vm7, %v409_v21, 0.0 }
  0x55   :  { %v384_v25 = vsub.f32 %v1082_v2, %v383_v19  ;;  %v385_v26 = vsub.f32 %v1089_v5, %v383_v19  ;;  %v729_v27 = vadd.f32 %v728_v20, %v727_v16  ;;  %v412_v28 = vadd.f32 %v411_v24, %v410_v23 }
  0x56   :  { %v1376_v31 = vpop.eup %943  ;;  %v703_v14 = vmul.f32 1.442695, %v701_v22  ;;  %v705_v32 = vmul.f32 1.442695, %v702_v13  ;;  %vm754_vm12 = vcmp.eq.s32.totalorder %v1310_v29, 12  ;;  %vm755_vm11 = vcmp.eq.s32.totalorder %v1312_v30, 12 }
  0x57   :  { %v1379_v33 = vpop.eup %945  ;;  %v637_v34 = vsel %vm304_vm7, %v1376_v31, 0.0  ;;  %v386_v35 = vand.u32 2147483647, %v384_v25  ;;  %v387_v36 = vand.u32 2147483647, %v385_v26  ;;  %v730_v37 = vrot.slane %v729_v27, 1 }
  0x58   :  { %v1384_v38 = vpop.eup %947  ;;  %v638_v39 = vsel %vm304_vm7, %v1379_v33, 0.0  ;;  %959 = vpow2.f32 %v703_v14  ;;  %v413_v40 = vrot.slane %v412_v28, 4  ;;  %v1389_v41 = vsel %vm754_vm12, %v1082_v2, 0.0 }
  0x59   :  { %v1391_v42 = vpop.eup %949  ;;  %v639_v43 = vadd.f32 %v638_v39, %v637_v34  ;;  %v324_v44 = vsel %vm304_vm7, %v1384_v38, 0.0  ;;  %961 = vpow2.f32 %v705_v32  ;;  %v388_v45 = vmul.f32 -1.0, %v386_v35 }
  0x5a   :  { %v1395_v46 = vpop.eup %951  ;;  %v325_v47 = vsel %vm304_vm7, %v1391_v42, 0.0  ;;  %v389_v48 = vmul.f32 -1.0, %v387_v36  ;;  %v731_v49 = vadd.f32 %v730_v37, %v729_v27  ;;  %v414_v50 = vadd.f32 %v413_v40, %v412_v28 }
  0x5b   :  { %v1399_v51 = vpop.eup %953  ;;  %v640_v52 = vrot.slane %v639_v43, 4  ;;  %v326_v53 = vadd.f32 %v325_v47, %v324_v44  ;;  %v672_v54 = vsel %vm304_vm7, %v1395_v46, 0.0  ;;  %v390_v55 = vmul.f32 1.442695, %v388_v45 }
  0x5c   :  { %v1403_v56 = vpop.eup %955  ;;  %v673_v57 = vsel %vm304_vm7, %v1399_v51, 0.0  ;;  %v392_v58 = vmul.f32 1.442695, %v389_v48  ;;  %v732_v59 = vsub.f32 %v1082_v2, %v731_v49  ;;  %v733_v60 = vsub.f32 %v1089_v5, %v731_v49 }
  0x5d   :  { %v1409_v61 = vpop.eup %957  ;;  %v641_v62 = vadd.f32 %v640_v52, %v639_v43  ;;  %v327_v63 = vrot.slane %v326_v53, 4  ;;  %v674_v0 = vadd.f32 %v673_v57, %v672_v54  ;;  %v359_v3 = vsel %vm304_vm7, %v1403_v56, 0.0 }
  0x5e   :  { %v360_v4 = vsel %vm304_vm7, %v1409_v61, 0.0  ;;  %963 = vpow2.f32 %v390_v55  ;;  %v734_v6 = vand.u32 2147483647, %v732_v59  ;;  %v735_v7 = vand.u32 2147483647, %v733_v60 }
  0x5f   :  { %v642_v8 = vrot.slane %v641_v62, 2  ;;  %v328_v9 = vadd.f32 %v327_v63, %v326_v53  ;;  %v675_v10 = vrot.slane %v674_v0, 4  ;;  %v361_v11 = vadd.f32 %v360_v4, %v359_v3 }
  0x60   :  { %965 = vpow2.f32 %v392_v58  ;;  %v736_v12 = vmul.f32 -1.0, %v734_v6  ;;  %v737_v15 = vmul.f32 -1.0, %v735_v7  ;;  %v415_v16 = vrot.slane %v414_v50, 2 }
  0x61   :  { %v643_v1 = vadd.f32 %v642_v8, %v641_v62  ;;  %v329_v17 = vrot.slane %v328_v9, 2  ;;  %v676_v18 = vadd.f32 %v675_v10, %v674_v0  ;;  %v362_v19 = vrot.slane %v361_v11, 4 }
  0x62   :  { %v1415_v20 = vpop.eup %959  ;;  %v738_v21 = vmul.f32 1.442695, %v736_v12  ;;  %v740_v22 = vmul.f32 1.442695, %v737_v15  ;;  %v416_v13 = vadd.f32 %v415_v16, %v414_v50  ;;  %v757_v23 = vsel %vm755_vm11, %v1089_v5, 0.0 }
  0x63   :  { %v1420_v24 = vpop.eup %961  ;;  %v644_v25 = vrot.slane %v643_v1, 1  ;;  %v330_v26 = vadd.f32 %v329_v17, %v328_v9  ;;  %v677_v27 = vrot.slane %v676_v18, 2  ;;  %v363_v28 = vadd.f32 %v362_v19, %v361_v11 }
  0x64   :  { %v707_v14 = vsel %vm304_vm7, %v1415_v20, 0.0  ;;  %v708_v32 = vsel %vm304_vm7, %v1420_v24, 0.0  ;;  %967 = vpow2.f32 %v738_v21  ;;  %v417_v34 = vrot.slane %v416_v13, 1 }
  0x65   :  { %v645_v35 = vadd.f32 %v644_v25, %v643_v1  ;;  %v331_v36 = vrot.slane %v330_v26, 1  ;;  %v678_v37 = vadd.f32 %v677_v27, %v676_v18  ;;  %v364_v39 = vrot.slane %v363_v28, 2 }
  0x66   :  { %v709_v40 = vadd.f32 %v708_v32, %v707_v14  ;;  %969 = vpow2.f32 %v740_v22  ;;  %v418_v43 = vadd.f32 %v417_v34, %v416_v13  ;;  %v758_v44 = vsel %vm304_vm7, %v1389_v41, 0.0 }
  0x67   :  { %971 = vrcp.f32 %v645_v35  ;;  %v332_v45 = vadd.f32 %v331_v36, %v330_v26  ;;  %v679_v47 = vrot.slane %v678_v37, 1  ;;  %v365_v48 = vadd.f32 %v364_v39, %v363_v28 }
  0x68   :  { %v1428_v49 = vpop.eup %963  ;;  %v710_v50 = vrot.slane %v709_v40, 4  ;;  %v419_v52 = vsub.f32 %v1082_v2, %v418_v43  ;;  %v420_v53 = vsub.f32 %v1089_v5, %v418_v43  ;;  %v759_v54 = vsel %vm304_vm7, %v757_v23, 0.0 }
  0x69   :  { %973 = vrcp.f32 %v332_v45  ;;  %v680_v55 = vadd.f32 %v679_v47, %v678_v37  ;;  %v366_v57 = vrot.slane %v365_v48, 1  ;;  %v394_v58 = vsel %vm304_vm7, %v1428_v49, 0.0 }
  0x6a   :  { %v1435_v41 = vpop.eup %965  ;;  %v711_v59 = vadd.f32 %v710_v50, %v709_v40  ;;  %v421_v60 = vand.u32 2147483647, %v419_v52  ;;  %v422_v62 = vand.u32 2147483647, %v420_v53  ;;  %v760_v63 = vadd.f32 %v759_v54, %v758_v44 }
  0x6b   :  { %975 = vrcp.f32 %v680_v55  ;;  %v367_v0 = vadd.f32 %v366_v57, %v365_v48  ;;  %v395_v3 = vsel %vm304_vm7, %v1435_v41, 0.0  ;;  %vm441_vm1 = vcmp.eq.s32.totalorder %v1310_v29, 4 }
  0x6c   :  { %v712_v4 = vrot.slane %v711_v59, 2  ;;  %v396_v6 = vadd.f32 %v395_v3, %v394_v58  ;;  %v423_v7 = vmul.f32 -1.0, %v421_v60  ;;  %v424_v8 = vmul.f32 -1.0, %v422_v62 }
  0x6d   :  { %977 = vrcp.f32 %v367_v0  ;;  %v761_v9 = vrot.slane %v760_v63, 4  ;;  %vm442_vm0 = vcmp.eq.s32.totalorder %v1312_v30, 4  ;;  %v443_v10 = vsel %vm441_vm1, %v1082_v2, 0.0 }
  0x6e   :  { %v1442_v11 = vpop.eup %967  ;;  %v713_v12 = vadd.f32 %v712_v4, %v711_v59  ;;  %v397_v15 = vrot.slane %v396_v6, 4  ;;  %v425_v16 = vmul.f32 1.442695, %v423_v7  ;;  %v427_v1 = vmul.f32 1.442695, %v424_v8 }
  0x6f   :  { %v742_v17 = vsel %vm304_vm7, %v1442_v11, 0.0  ;;  %v762_v18 = vadd.f32 %v761_v9, %v760_v63  ;;  %v444_v19 = vsel %vm442_vm0, %v1089_v5, 0.0  ;;  %v445_v21 = vsel %vm304_vm7, %v443_v10, 0.0 }
  0x70   :  { %v1448_v22 = vpop.eup %969  ;;  %v714_v13 = vrot.slane %v713_v12, 1  ;;  %v398_v23 = vadd.f32 %v397_v15, %v396_v6  ;;  %979 = vpow2.f32 %v425_v16  ;;  %v446_v25 = vsel %vm304_vm7, %v444_v19, 0.0  ;;  %v1482_v15 = vld [vmem:[%s1623_s0] sm:$0xff] }
  0x71   :  { %v972_v26 = vpop.eup %971  ;;  %v743_v27 = vsel %vm304_vm7, %v1448_v22, 0.0  ;;  %981 = vpow2.f32 %v427_v1  ;;  %v763_v28 = vrot.slane %v762_v18, 2  ;;  %v447_v14 = vadd.f32 %v446_v25, %v445_v21  ;;  %v1488_v25 = vld [vmem:[%s1623_s0 + $0x8] sm:$0xff]  ;;  %s1066_s0 = smov [#allocation2]  }
  0x72   :  { %v647_v32 = vmul.f32 %v972_v26, %v1376_v31  ;;  %v648_v34 = vmul.f32 %v972_v26, %v1379_v33  ;;  %v715_v35 = vadd.f32 %v714_v13, %v713_v12  ;;  %v399_v36 = vrot.slane %v398_v23, 2  ;;  %s933_s14 = sshll.u32 %s1066_s0, 4  ;;  %s934_s14 = int_to_ptr.vmem [resolvable:$true] %s933_s14 }
  0x73   :  { %v974_v37 = vpop.eup %973  ;;  %v744_v39 = vadd.f32 %v743_v27, %v742_v17  ;;  %v764_v40 = vadd.f32 %v763_v28, %v762_v18  ;;  %v448_v43 = vrot.slane %v447_v14, 4  ;;  %vm789_vm15 = vcmp.eq.s32.totalorder %v1310_v29, 13  ;;  %s1041_s15 = scalar_lea.vmem %s934_s14, 256  ;;  %p1046_p1 = scmp.lt.s32.totalorder %s934_s14, %s934_s14 }
  0x74   :  { %894 = vxpose.xlu1.b32.start [1/16] (narrow) %v647_v32, 8  ;;  %v334_v44 = vmul.f32 %v974_v37, %v1384_v38  ;;  %v335_v45 = vmul.f32 %v974_v37, %v1391_v42  ;;  %983 = vrcp.f32 %v715_v35  ;;  %v400_v47 = vadd.f32 %v399_v36, %v398_v23  ;;  %p1042_p0 = scmp.ne.s32.totalorder %s934_s14, %s1041_s15  ;;  %p1047_p2 = scmp.lt.s32.totalorder %s1041_s15, %s1041_s15 }
  0x75   :  { %v976_v48 = vpop.eup %975  ;;  %v745_v50 = vrot.slane %v744_v39, 4  ;;  %v765_v31 = vrot.slane %v764_v40, 1  ;;  %v449_v52 = vadd.f32 %v448_v43, %v447_v14  ;;  %vm790_vm5 = vcmp.eq.s32.totalorder %v1312_v30, 13 }
  0x76   :  { %581 = vxpose.xlu0.b32.start [1/16] (narrow) %v334_v44, 8  ;;  %v682_v33 = vmul.f32 %v976_v48, %v1395_v46  ;;  %v683_v53 = vmul.f32 %v976_v48, %v1399_v51  ;;  %v401_v54 = vrot.slane %v400_v47, 1  ;;  %v791_v55 = vsel %vm789_vm15, %v1082_v2, 0.0  ;;  %p1048_p3 = por %p1047_p2, %p1046_p1 }
  0x77   :  { %v978_v57 = vpop.eup %977  ;;  %v746_v38 = vadd.f32 %v745_v50, %v744_v39  ;;  %v766_v58 = vadd.f32 %v765_v31, %v764_v40  ;;  %v450_v42 = vrot.slane %v449_v52, 2  ;;  %v792_v59 = vsel %vm790_vm5, %v1089_v5, 0.0 }
  0x78   :  { %895 = vxpose.xlu1.b32.cont [2/16] (narrow) %v648_v34, 8  ;;  %v369_v60 = vmul.f32 %v978_v57, %v1403_v56  ;;  %v370_v62 = vmul.f32 %v978_v57, %v1409_v61  ;;  %v402_v63 = vadd.f32 %v401_v54, %v400_v47  ;;  %v793_v0 = vsel %vm304_vm7, %v791_v55, 0.0  ;;  %p1049_p4 = pnand %p1048_p3, %p1042_p0 }
  0x79   :  { %v747_v46 = vrot.slane %v746_v38, 2  ;;  %v767_v51 = vsub.f32 %v1082_v2, %v766_v58  ;;  %v768_v3 = vsub.f32 %v1089_v5, %v766_v58  ;;  %v451_v4 = vadd.f32 %v450_v42, %v449_v52 }
  0x7a   :  { %v1468_v6 = vpop.eup %979  ;;  %582 = vxpose.xlu0.b32.cont [2/16] (narrow) %v335_v45, 8  ;;  %985 = vrcp.f32 %v402_v63  ;;  %v794_v7 = vsel %vm304_vm7, %v792_v59, 0.0  ;;  %vm476_vm10 = vcmp.eq.s32.totalorder %v1310_v29, 5  ;;  %vm477_vm3 = vcmp.eq.s32.totalorder %v1312_v30, 5 }
  0x7b   :  { %v1473_v56 = vpop.eup %981  ;;  %v748_v61 = vadd.f32 %v747_v46, %v746_v38  ;;  %v429_v8 = vsel %vm304_vm7, %v1468_v6, 0.0  ;;  %v769_v2 = vand.u32 2147483647, %v767_v51  ;;  %v770_v9 = vand.u32 2147483647, %v768_v3 }
  0x7c   :  { %896 = vxpose.xlu1.b32.cont [3/16] (narrow) %v682_v33, 8  ;;  %v430_v5 = vsel %vm304_vm7, %v1473_v56, 0.0  ;;  %v452_v10 = vrot.slane %v451_v4, 1  ;;  %v795_v12 = vadd.f32 %v794_v7, %v793_v0  ;;  %v478_v16 = vsel %vm476_vm10, %v1482_v15, 0.0 }
  0x7d   :  { %v749_v1 = vrot.slane %v748_v61, 1  ;;  %v431_v17 = vadd.f32 %v430_v5, %v429_v8  ;;  %v771_v18 = vmul.f32 -1.0, %v769_v2  ;;  %v772_v19 = vmul.f32 -1.0, %v770_v9 }
  0x7e   :  { %v984_v21 = vpop.eup %983  ;;  %583 = vxpose.xlu0.b32.cont [3/16] (narrow) %v369_v60, 8  ;;  %v453_v13 = vadd.f32 %v452_v10, %v451_v4  ;;  %v796_v23 = vrot.slane %v795_v12, 4  ;;  %v479_v26 = vsel %vm477_vm3, %v1488_v25, 0.0  ;;  %v480_v27 = vsel %vm304_vm7, %v478_v16, 0.0 }
  0x7f   :  { %v717_v28 = vmul.f32 %v984_v21, %v1415_v20  ;;  %v718_v14 = vmul.f32 %v984_v21, %v1420_v24  ;;  %v750_v32 = vadd.f32 %v749_v1, %v748_v61  ;;  %v432_v34 = vrot.slane %v431_v17, 4 }
  0x80   :  { %897 = vxpose.xlu1.b32.cont [4/16] (narrow) %v683_v53, 8  ;;  %v773_v35 = vmul.f32 1.442695, %v771_v18  ;;  %v775_v36 = vmul.f32 1.442695, %v772_v19  ;;  %v454_v37 = vsub.f32 %v1482_v15, %v453_v13  ;;  %v455_v39 = vsub.f32 %v1488_v25, %v453_v13 }
  0x81   :  { %987 = vrcp.f32 %v750_v32  ;;  %v433_v40 = vadd.f32 %v432_v34, %v431_v17  ;;  %v797_v43 = vadd.f32 %v796_v23, %v795_v12  ;;  %v481_v44 = vsel %vm304_vm7, %v479_v26, 0.0 }
  0x82   :  { %584 = vxpose.xlu0.b32.cont [4/16] (narrow) %v370_v62, 8  ;;  %989 = vpow2.f32 %v773_v35  ;;  %v456_v45 = vand.u32 2147483647, %v454_v37  ;;  %v457_v20 = vand.u32 2147483647, %v455_v39  ;;  %v482_v47 = vadd.f32 %v481_v44, %v480_v27 }
  0x83   :  { %v434_v24 = vrot.slane %v433_v40, 2  ;;  %991 = vpow2.f32 %v775_v36  ;;  %v798_v48 = vrot.slane %v797_v43, 2  ;;  %vm824_vm13 = vcmp.eq.s32.totalorder %v1310_v29, 14 }
  0x84   :  { %v986_v50 = vpop.eup %985  ;;  %898 = vxpose.xlu1.b32.cont [5/16] (narrow) %v717_v28, 8  ;;  %v458_v31 = vmul.f32 -1.0, %v456_v45  ;;  %v459_v52 = vmul.f32 -1.0, %v457_v20  ;;  %v483_v33 = vrot.slane %v482_v47, 4  ;;  %vm825_vm6 = vcmp.eq.s32.totalorder %v1312_v30, 14 }
  0x85   :  { %v404_v53 = vmul.f32 %v986_v50, %v1428_v49  ;;  %v405_v54 = vmul.f32 %v986_v50, %v1435_v41  ;;  %v435_v55 = vadd.f32 %v434_v24, %v433_v40  ;;  %v799_v57 = vadd.f32 %v798_v48, %v797_v43 }
  0x86   :  { %v460_v38 = vmul.f32 1.442695, %v458_v31  ;;  %v462_v58 = vmul.f32 1.442695, %v459_v52  ;;  %v484_v42 = vadd.f32 %v483_v33, %v482_v47  ;;  %v826_v59 = vsel %vm824_vm13, %v1482_v15, 0.0 }
  0x87   :  { %585 = vxpose.xlu0.b32.cont [5/16] (narrow) %v404_v53, 8  ;;  %v436_v60 = vrot.slane %v435_v55, 1  ;;  %v800_v62 = vrot.slane %v799_v57, 1  ;;  %v827_v63 = vsel %vm825_vm6, %v1488_v25, 0.0  ;;  %v828_v0 = vsel %vm304_vm7, %v826_v59, 0.0 }
  0x88   :  { %899 = vxpose.xlu1.b32.cont [6/16] (narrow) %v718_v14, 8  ;;  %993 = vpow2.f32 %v460_v38  ;;  %v485_v46 = vrot.slane %v484_v42, 2  ;;  %v829_v49 = vsel %vm304_vm7, %v827_v63, 0.0  ;;  %vm511_vm4 = vcmp.eq.s32.totalorder %v1310_v29, 6 }
  0x89   :  { %v437_v41 = vadd.f32 %v436_v60, %v435_v55  ;;  %995 = vpow2.f32 %v462_v58  ;;  %v801_v51 = vadd.f32 %v800_v62, %v799_v57  ;;  %v830_v3 = vadd.f32 %v829_v49, %v828_v0 }
  0x8a   :  { %v486_v4 = vadd.f32 %v485_v46, %v484_v42  ;;  %vm512_vm8 = vcmp.eq.s32.totalorder %v1312_v30, 6  ;;  %v513_v7 = vsel %vm511_vm4, %v1482_v15, 0.0  ;;  %vm859_vm2 = vcmp.eq.s32.totalorder %v1310_v29, 15 }
  0x8b   :  { %v988_v61 = vpop.eup %987  ;;  %586 = vxpose.xlu0.b32.cont [6/16] (narrow) %v405_v54, 8  ;;  %997 = vrcp.f32 %v437_v41  ;;  %v802_v8 = vsub.f32 %v1482_v15, %v801_v51  ;;  %v803_v2 = vsub.f32 %v1488_v25, %v801_v51  ;;  %v831_v9 = vrot.slane %v830_v3, 4 }
  0x8c   :  { %v1512_v5 = vpop.eup %989  ;;  %v752_v10 = vmul.f32 %v988_v61, %v1442_v11  ;;  %v753_v12 = vmul.f32 %v988_v61, %v1448_v22  ;;  %v487_v16 = vrot.slane %v486_v4, 1  ;;  %v514_v1 = vsel %vm512_vm8, %v1488_v25, 0.0 }
  0x8d   :  { %v1517_v17 = vpop.eup %991  ;;  %v777_v18 = vsel %vm304_vm7, %v1512_v5, 0.0  ;;  %v804_v19 = vand.u32 2147483647, %v802_v8  ;;  %v805_v21 = vand.u32 2147483647, %v803_v2  ;;  %v832_v13 = vadd.f32 %v831_v9, %v830_v3 }
  0x8e   :  { %900 = vxpose.xlu1.b32.cont [7/16] (narrow) %v752_v10, 8  ;;  %v778_v23 = vsel %vm304_vm7, %v1517_v17, 0.0  ;;  %v488_v11 = vadd.f32 %v487_v16, %v486_v4  ;;  %v515_v22 = vsel %vm304_vm7, %v513_v7, 0.0  ;;  %v516_v26 = vsel %vm304_vm7, %v514_v1, 0.0 }
  0x8f   :  { %v779_v27 = vadd.f32 %v778_v23, %v777_v18  ;;  %v806_v28 = vmul.f32 -1.0, %v804_v19  ;;  %v807_v14 = vmul.f32 -1.0, %v805_v21  ;;  %v833_v32 = vrot.slane %v832_v13, 2 }
  0x90   :  { %v489_v34 = vsub.f32 %v1482_v15, %v488_v11  ;;  %v490_v35 = vsub.f32 %v1488_v25, %v488_v11  ;;  %v517_v36 = vadd.f32 %v516_v26, %v515_v22  ;;  %vm860_vm14 = vcmp.eq.s32.totalorder %v1312_v30, 15 }
  0x91   :  { %v780_v37 = vrot.slane %v779_v27, 4  ;;  %v808_v39 = vmul.f32 1.442695, %v806_v28  ;;  %v810_v40 = vmul.f32 1.442695, %v807_v14  ;;  %v834_v43 = vadd.f32 %v833_v32, %v832_v13 }
  0x92   :  { %v1529_v44 = vpop.eup %993  ;;  %901 = vxpose.xlu1.b32.cont [8/16] (narrow) %v753_v12, 8  ;;  %v491_v45 = vand.u32 2147483647, %v489_v34  ;;  %v492_v20 = vand.u32 2147483647, %v490_v35  ;;  %v518_v47 = vrot.slane %v517_v36, 4 }
  0x93   :  { %v1531_v24 = vpop.eup %995  ;;  %v781_v48 = vadd.f32 %v780_v37, %v779_v27  ;;  %v464_v50 = vsel %vm304_vm7, %v1529_v44, 0.0  ;;  %999 = vpow2.f32 %v808_v39  ;;  %v835_v31 = vrot.slane %v834_v43, 1 }
  0x94   :  { %v465_v52 = vsel %vm304_vm7, %v1531_v24, 0.0  ;;  %1001 = vpow2.f32 %v810_v40  ;;  %v493_v33 = vmul.f32 -1.0, %v491_v45  ;;  %v494_v53 = vmul.f32 -1.0, %v492_v20 }
  0x95   :  { %v998_v54 = vpop.eup %997  ;;  %v782_v55 = vrot.slane %v781_v48, 2  ;;  %v466_v57 = vadd.f32 %v465_v52, %v464_v50  ;;  %v836_v38 = vadd.f32 %v835_v31, %v834_v43  ;;  %v519_v58 = vadd.f32 %v518_v47, %v517_v36 }
  0x96   :  { %v439_v42 = vmul.f32 %v998_v54, %v1468_v6  ;;  %v440_v59 = vmul.f32 %v998_v54, %v1473_v56  ;;  %v495_v60 = vmul.f32 1.442695, %v493_v33  ;;  %v497_v62 = vmul.f32 1.442695, %v494_v53 }
  0x97   :  { %v783_v63 = vadd.f32 %v782_v55, %v781_v48  ;;  %v467_v0 = vrot.slane %v466_v57, 4  ;;  %v837_v46 = vsub.f32 %v1482_v15, %v836_v38  ;;  %v838_v49 = vsub.f32 %v1488_v25, %v836_v38 }
  0x98   :  { %587 = vxpose.xlu0.b32.cont [7/16] (narrow) %v439_v42, 8  ;;  %1003 = vpow2.f32 %v495_v60  ;;  %v520_v41 = vrot.slane %v519_v58, 2  ;;  %v861_v51 = vsel %vm859_vm2, %v1482_v15, 0.0  ;;  %v862_v6 = vsel %vm860_vm14, %v1488_v25, 0.0 }
  0x99   :  { %v784_v56 = vrot.slane %v783_v63, 1  ;;  %v468_v3 = vadd.f32 %v467_v0, %v466_v57  ;;  %1005 = vpow2.f32 %v497_v62  ;;  %v839_v4 = vand.u32 2147483647, %v837_v46 }
  0x9a   :  { %v840_v7 = vand.u32 2147483647, %v838_v49  ;;  %v521_v61 = vadd.f32 %v520_v41, %v519_v58  ;;  %v863_v8 = vsel %vm304_vm7, %v861_v51, 0.0  ;;  %v864_v2 = vsel %vm304_vm7, %v862_v6, 0.0 }
  0x9b   :  { %v785_v9 = vadd.f32 %v784_v56, %v783_v63  ;;  %v469_v10 = vrot.slane %v468_v3, 2  ;;  %v841_v12 = vmul.f32 -1.0, %v839_v4  ;;  %v865_v16 = vadd.f32 %v864_v2, %v863_v8 }
  0x9c   :  { %588 = vxpose.xlu0.b32.cont [8/16] (narrow) %v440_v59, 8  ;;  %v842_v1 = vmul.f32 -1.0, %v840_v7  ;;  %v522_v18 = vrot.slane %v521_v61, 1  ;;  %vm546_vm9 = vcmp.eq.s32.totalorder %v1310_v29, 7  ;;  %vm547_vm12 = vcmp.eq.s32.totalorder %v1312_v30, 7 }
  0x9d   :  { %v1551_v19 = vpop.eup %999  ;;  %1007 = vrcp.f32 %v785_v9  ;;  %v470_v21 = vadd.f32 %v469_v10, %v468_v3  ;;  %v843_v13 = vmul.f32 1.442695, %v841_v12  ;;  %v866_v23 = vrot.slane %v865_v16, 4 }
  0x9e   :  { %v1553_v11 = vpop.eup %1001  ;;  %v812_v22 = vsel %vm304_vm7, %v1551_v19, 0.0  ;;  %v845_v26 = vmul.f32 1.442695, %v842_v1  ;;  %v523_v27 = vadd.f32 %v522_v18, %v521_v61  ;;  %v548_v28 = vsel %vm546_vm9, %v1482_v15, 0.0 }
  0x9f   :  { %v471_v14 = vrot.slane %v470_v21, 1  ;;  %v813_v29 = vsel %vm304_vm7, %v1553_v11, 0.0  ;;  %1009 = vpow2.f32 %v843_v13  ;;  %v867_v32 = vadd.f32 %v866_v23, %v865_v16 }
  0xa0   :  { %v814_v34 = vadd.f32 %v813_v29, %v812_v22  ;;  %1011 = vpow2.f32 %v845_v26  ;;  %v524_v35 = vsub.f32 %v1482_v15, %v523_v27  ;;  %v525_v36 = vsub.f32 %v1488_v25, %v523_v27 }
  0xa1   :  { %v472_v37 = vadd.f32 %v471_v14, %v470_v21  ;;  %v868_v39 = vrot.slane %v867_v32, 2  ;;  %v549_v40 = vsel %vm547_vm12, %v1488_v25, 0.0  ;;  %v550_v43 = vsel %vm304_vm7, %v548_v28, 0.0 }
  0xa2   :  { %v1566_v45 = vpop.eup %1003  ;;  %v815_v20 = vrot.slane %v814_v34, 4  ;;  %v526_v47 = vand.u32 2147483647, %v524_v35  ;;  %v527_v48 = vand.u32 2147483647, %v525_v36  ;;  %v551_v50 = vsel %vm304_vm7, %v549_v40, 0.0 }
  0xa3   :  { %v1569_v31 = vpop.eup %1005  ;;  %1013 = vrcp.f32 %v472_v37  ;;  %v499_v52 = vsel %vm304_vm7, %v1566_v45, 0.0  ;;  %v869_v33 = vadd.f32 %v868_v39, %v867_v32  ;;  %v552_v53 = vadd.f32 %v551_v50, %v550_v43 }
  0xa4   :  { %v816_v54 = vadd.f32 %v815_v20, %v814_v34  ;;  %v500_v30 = vsel %vm304_vm7, %v1569_v31, 0.0  ;;  %v528_v55 = vmul.f32 -1.0, %v526_v47  ;;  %v529_v57 = vmul.f32 -1.0, %v527_v48 }
  0xa5   :  { %v501_v38 = vadd.f32 %v500_v30, %v499_v52  ;;  %v870_v58 = vrot.slane %v869_v33, 1  ;;  %v553_v42 = vrot.slane %v552_v53, 4 }
  0xa6   :  { %v817_v59 = vrot.slane %v816_v54, 2  ;;  %v530_v60 = vmul.f32 1.442695, %v528_v55  ;;  %v532_v62 = vmul.f32 1.442695, %v529_v57 }
  0xa7   :  { %v1008_v63 = vpop.eup %1007  ;;  %v502_v0 = vrot.slane %v501_v38, 4  ;;  %v871_v46 = vadd.f32 %v870_v58, %v869_v33  ;;  %v554_v49 = vadd.f32 %v553_v42, %v552_v53 }
  0xa8   :  { %v787_v41 = vmul.f32 %v1008_v63, %v1512_v5  ;;  %v818_v51 = vadd.f32 %v817_v59, %v816_v54  ;;  %1015 = vpow2.f32 %v530_v60  ;;  %v788_v61 = vmul.f32 %v1008_v63, %v1517_v17 }
  0xa9   :  { %v1576_v6 = vpop.eup %1009  ;;  %v503_v56 = vadd.f32 %v502_v0, %v501_v38  ;;  %1017 = vpow2.f32 %v532_v62  ;;  %v872_v3 = vsub.f32 %v1482_v15, %v871_v46  ;;  %v873_v4 = vsub.f32 %v1488_v25, %v871_v46 }
  0xaa   :  { %v1580_v7 = vpop.eup %1011  ;;  %902 = vxpose.xlu1.b32.cont [9/16] (narrow) %v787_v41, 8  ;;  %v819_v8 = vrot.slane %v818_v51, 1  ;;  %v847_v2 = vsel %vm304_vm7, %v1576_v6, 0.0  ;;  %v555_v5 = vrot.slane %v554_v49, 2 }
  0xab   :  { %v504_v9 = vrot.slane %v503_v56, 2  ;;  %v848_v10 = vsel %vm304_vm7, %v1580_v7, 0.0  ;;  %v874_v12 = vand.u32 2147483647, %v872_v3  ;;  %v875_v16 = vand.u32 2147483647, %v873_v4 }
  0xac   :  { %v820_v1 = vadd.f32 %v819_v8, %v818_v51  ;;  %v849_v18 = vadd.f32 %v848_v10, %v847_v2  ;;  %v556_v21 = vadd.f32 %v555_v5, %v554_v49 }
  0xad   :  { %v1014_v13 = vpop.eup %1013  ;;  %v505_v23 = vadd.f32 %v504_v9, %v503_v56  ;;  %v876_v22 = vmul.f32 -1.0, %v874_v12  ;;  %v877_v26 = vmul.f32 -1.0, %v875_v16 }
  0xae   :  { %v474_v17 = vmul.f32 %v1014_v13, %v1529_v44  ;;  %903 = vxpose.xlu1.b32.cont [10/16] (narrow) %v788_v61, 8  ;;  %1019 = vrcp.f32 %v820_v1  ;;  %v850_v27 = vrot.slane %v849_v18, 4  ;;  %v557_v32 = vrot.slane %v556_v21, 1 }
  0xaf   :  { %v506_v28 = vrot.slane %v505_v23, 1  ;;  %v878_v14 = vmul.f32 1.442695, %v876_v22  ;;  %v880_v29 = vmul.f32 1.442695, %v877_v26  ;;  %v475_v34 = vmul.f32 %v1014_v13, %v1531_v24 }
  0xb0   :  { %589 = vxpose.xlu0.b32.cont [9/16] (narrow) %v474_v17, 8  ;;  %v851_v35 = vadd.f32 %v850_v27, %v849_v18  ;;  %v558_v37 = vadd.f32 %v557_v32, %v556_v21 }
  0xb1   :  { %v507_v36 = vadd.f32 %v506_v28, %v505_v23  ;;  %1021 = vpow2.f32 %v878_v14 }
  0xb2   :  { %v1589_v39 = vpop.eup %1015  ;;  %v852_v40 = vrot.slane %v851_v35, 2  ;;  %1023 = vpow2.f32 %v880_v29  ;;  %v559_v20 = vsub.f32 %v1482_v15, %v558_v37  ;;  %v560_v47 = vsub.f32 %v1488_v25, %v558_v37 }
  0xb3   :  { %v1591_v43 = vpop.eup %1017  ;;  %1025 = vrcp.f32 %v507_v36  ;;  %v534_v44 = vsel %vm304_vm7, %v1589_v39, 0.0 }
  0xb4   :  { %590 = vxpose.xlu0.b32.cont [10/16] (narrow) %v475_v34, 8  ;;  %v853_v24 = vadd.f32 %v852_v40, %v851_v35  ;;  %v535_v48 = vsel %vm304_vm7, %v1591_v43, 0.0  ;;  %v561_v52 = vand.u32 2147483647, %v559_v20  ;;  %v562_v33 = vand.u32 2147483647, %v560_v47 }
  0xb5   :  { %v536_v50 = vadd.f32 %v535_v48, %v534_v44 }
  0xb6   :  { %v854_v53 = vrot.slane %v853_v24, 1  ;;  %v563_v30 = vmul.f32 -1.0, %v561_v52  ;;  %v564_v55 = vmul.f32 -1.0, %v562_v33 }
  0xb7   :  { %v537_v54 = vrot.slane %v536_v50, 4 }
  0xb8   :  { %v1020_v57 = vpop.eup %1019  ;;  %v855_v38 = vadd.f32 %v854_v53, %v853_v24  ;;  %v565_v15 = vmul.f32 1.442695, %v563_v30  ;;  %v567_v25 = vmul.f32 1.442695, %v564_v55 }
  0xb9   :  { %v822_v58 = vmul.f32 %v1020_v57, %v1551_v19  ;;  %v538_v42 = vadd.f32 %v537_v54, %v536_v50  ;;  %v823_v60 = vmul.f32 %v1020_v57, %v1553_v11 }
  0xba   :  { %1027 = vrcp.f32 %v855_v38 }
  0xbb   :  { %v1022_v59 = vpop.eup %1021  ;;  %904 = vxpose.xlu1.b32.cont [11/16] (narrow) %v822_v58, 8  ;;  %v539_v62 = vrot.slane %v538_v42, 2  ;;  %1029 = vpow2.f32 %v565_v15 }
  0xbc   :  { %v1024_v63 = vpop.eup %1023  ;;  %v882_v0 = vsel %vm304_vm7, %v1022_v59, 0.0  ;;  %1031 = vpow2.f32 %v567_v25 }
  0xbd   :  { %v1026_v46 = vpop.eup %1025  ;;  %v540_v49 = vadd.f32 %v539_v62, %v538_v42  ;;  %v883_v41 = vsel %vm304_vm7, %v1024_v63, 0.0 }
  0xbe   :  { %v509_v19 = vmul.f32 %v1026_v46, %v1566_v45  ;;  %v884_v51 = vadd.f32 %v883_v41, %v882_v0  ;;  %v510_v3 = vmul.f32 %v1026_v46, %v1569_v31 }
  0xbf   :  { %905 = vxpose.xlu1.b32.cont [12/16] (narrow) %v823_v60, 8  ;;  %v541_v56 = vrot.slane %v540_v49, 1 }
  0xc0   :  { %591 = vxpose.xlu0.b32.cont [11/16] (narrow) %v509_v19, 8  ;;  %v885_v4 = vrot.slane %v884_v51, 4 }
  0xc1   :  { %v542_v11 = vadd.f32 %v541_v56, %v540_v49 }
  0xc2   :  { %v886_v61 = vadd.f32 %v885_v4, %v884_v51 }
  0xc3   :  { %1033 = vrcp.f32 %v542_v11 }
  0xc4   :  { %v1028_v8 = vpop.eup %1027  ;;  %592 = vxpose.xlu0.b32.cont [12/16] (narrow) %v510_v3, 8  ;;  %v887_v2 = vrot.slane %v886_v61, 2 }
  0xc5   :  { %v1030_v5 = vpop.eup %1029  ;;  %v857_v9 = vmul.f32 %v1028_v8, %v1576_v6  ;;  %v858_v16 = vmul.f32 %v1028_v8, %v1580_v7 }
  0xc6   :  { %v1032_v10 = vpop.eup %1031  ;;  %v888_v12 = vadd.f32 %v887_v2, %v886_v61  ;;  %v569_v45 = vsel %vm304_vm7, %v1030_v5, 0.0 }
  0xc7   :  { %906 = vxpose.xlu1.b32.cont [13/16] (narrow) %v857_v9, 8  ;;  %v570_v1 = vsel %vm304_vm7, %v1032_v10, 0.0 }
  0xc8   :  { %v889_v31 = vrot.slane %v888_v12, 1  ;;  %v571_v18 = vadd.f32 %v570_v1, %v569_v45 }
  0xca   :  { %v890_v21 = vadd.f32 %v889_v31, %v888_v12  ;;  %v572_v13 = vrot.slane %v571_v18, 4 }
  0xcb   :  { %907 = vxpose.xlu1.b32.cont [14/16] (narrow) %v858_v16, 8 }
  0xcc   :  { %1035 = vrcp.f32 %v890_v21  ;;  %v573_v23 = vadd.f32 %v572_v13, %v571_v18 }
  0xcd   :  { %v1034_v22 = vpop.eup %1033 }
  0xce   :  { %v544_v26 = vmul.f32 %v1034_v22, %v1589_v39  ;;  %v574_v6 = vrot.slane %v573_v23, 2  ;;  %v545_v17 = vmul.f32 %v1034_v22, %v1591_v43 }
  0xd0   :  { %593 = vxpose.xlu0.b32.cont [13/16] (narrow) %v544_v26, 8  ;;  %v575_v27 = vadd.f32 %v574_v6, %v573_v23 }
  0xd2   :  { %v576_v28 = vrot.slane %v575_v27, 1 }
  0xd4   :  { %594 = vxpose.xlu0.b32.cont [14/16] (narrow) %v545_v17, 8  ;;  %v577_v7 = vadd.f32 %v576_v28, %v575_v27 }
  0xd6   :  { %v1036_v14 = vpop.eup %1035  ;;  %1037 = vrcp.f32 %v577_v7 }
  0xd7   :  { %v892_v29 = vmul.f32 %v1036_v14, %v1022_v59  ;;  %v893_v32 = vmul.f32 %v1036_v14, %v1024_v63 }
  0xd9   :  { %908 = vxpose.xlu1.b32.cont [15/16] (narrow) %v892_v29, 8 }
  0xdd   :  { %909 = vxpose.xlu1.b32.end [16/16] (narrow) %v893_v32, 8 }
  0xe0   :  { %v1038_v34 = vpop.eup %1037 }
  0xe1   :  { %v579_v35 = vmul.f32 %v1038_v34, %v1030_v5  ;;  %v580_v36 = vmul.f32 %v1038_v34, %v1032_v10 }
  0xe3   :  { %595 = vxpose.xlu0.b32.cont [15/16] (narrow) %v579_v35, 8 }
  0xe7   :  { %596 = vxpose.xlu0.b32.end [16/16] (narrow) %v580_v36, 8 }
 0x121   :  { %v910_v37 = vpop.trf.xlu1 }
 0x122   :  { %926 = vst [vmem:[#allocation2 + $0x8] sm:$0xff] %v910_v37 }
 0x12b   :  { %v597_v39 = vpop.trf.xlu0 }
 0x12c   :  { %613 = vst [vmem:[#allocation2] sm:$0xff] %v597_v39 }
 0x12d   :  { %1052 = shalt.err (!%p1049_p4)
}
 0x12e   :  { %s1053_s18 = scalar_lea.hbm %s1624_s1, 256 }
 0x12f   :  { %p1054_p5 = scmp.ne.s32.totalorder %s1624_s1, %s1053_s18  ;;  %p1057_p6 = scmp.lt.u32.totalorder %s1053_s18, %s1624_s1 }
 0x131   :  { %p1059_p7 = pnand %p1057_p6, %p1054_p5 }
 0x133   :  { %1062 = shalt.err (!%p1059_p7)
}
 0x134   :  { %936 = dma.vmem_to_hbm [thread:$0]  %s934_s14, 256, %s1624_s1, [#allocation3]  }
 0x135   :  { %1063 = dma.done.wait [#allocation3], 256  }
 0x136   :  { %1064 = vsyncadd [#allocation3], 4294967040 }
 0x137   :  { %940 = vsyncpa [#allocation3], 1 }

</bundles_post_ra>
